<compile_context>
chip_gen: v5e
topology: v5e:2x2
jax: 0.10.0
libtpu: 0.0.40
codegen_flags: <defaults>
</compile_context>

<pallas_src>
import numpy as np
import jax
import jax.numpy as jnp
from jax.experimental import pallas as pl
from jax.experimental.pallas import tpu as pltpu

MEAN = np.array([0.485, 0.456, 0.406], dtype=np.float32)
STD = np.array([0.229, 0.224, 0.225], dtype=np.float32)

_OUT = 224   # final spatial size
_MID = 32    # intermediate resize size

# Conservative ceiling for the resident-image design (leaves headroom under
# v7x's 64 MiB physical VMEM / the scoped limits elsewhere).
_VMEM_CEILING_BYTES = 48 * (1 << 20)


def _resize_matrix(in_size: int, out_size: int) -> np.ndarray:
    """Bilinear (triangle filter) interpolation matrix, align_corners=False.

    Antialiased for downscale (support widened to the scale factor), matching
    torchvision's Resize(..., antialias=True) semantics up to PIL rounding.
    Returns (out_size, in_size) float64 so that  out = R @ x  resizes rows.
    """
    scale = in_size / out_size
    support = scale if scale > 1.0 else 1.0
    out_c = (np.arange(out_size, dtype=np.float64) + 0.5) * scale - 0.5
    in_c = np.arange(in_size, dtype=np.float64)
    d = np.abs(out_c[:, None] - in_c[None, :]) / support
    w = np.clip(1.0 - d, 0.0, None)
    w = w / np.maximum(w.sum(axis=1, keepdims=True), 1e-12)
    return w


def _preproc_kernel(x_ref, rh_ref, rw_ref, scale_ref, bias_ref, o_ref, xw_ref):
    """Fused resize->resize->normalize.

    Refs (single grid step, everything resident):
      x_ref    : (P*H, W)       uint8 image planes, flattened over (plane, row)
      rh_ref   : (224, H)       combined row-resize matrix (1/255 folded in)
      rw_ref   : (W, 224)       combined col-resize matrix
      scale_ref: (P,) f32 SMEM  per-plane 1/std
      bias_ref : (P,) f32 SMEM  per-plane -mean/std
      o_ref    : (P, 224, 224)
      xw_ref   : (P*H, 224) f32 VMEM scratch (W-resized planes)
    """
    n_planes = o_ref.shape[0]
    h_in = x_ref.shape[0] // n_planes

    # Stage 1 — batched across planes: one (P*H, W) @ (W, 224) MXU dispatch,
    # uint8 -> f32 convert done in a single pass.  Staged in VMEM scratch so
    # the per-plane matmuls stream their LHS from VMEM (low vreg pressure).
    xw_ref[...] = jnp.dot(x_ref[...].astype(jnp.float32), rw_ref[...],
                          preferred_element_type=jnp.float32)

    # Stage 2 — per plane: H-direction resize + fused Normalize epilogue.
    for c in range(n_planes):            # static unroll, tiny trip count
        t = jnp.dot(rh_ref[...], xw_ref[pl.ds(c * h_in, h_in), :],
                    preferred_element_type=jnp.float32)
        o_ref[c] = (t * scale_ref[c] + bias_ref[c]).astype(o_ref.dtype)


def sirena_preprocess(img_u8: jax.Array, out_dtype=jnp.float32) -> jax.Array:
    """SIRENa.trans_img equivalent: uint8 NCHW image -> normalized (N,3,224,224).

    out_dtype=jnp.bfloat16 halves the HBM writeback (≈90% of bytes moved) if
    the downstream consumers accept bf16 activations.
    """
    B, C, H, W = img_u8.shape
    if C != 3:
        raise ValueError(f"SIRENa preprocessing expects RGB input (C=3), got C={C}")
    P = B * C
    x = img_u8.reshape(P * H, W)        # uint8 goes straight into the kernel

    # Combined resize matrices, composed in float64, then cast to f32:
    #   out = RH @ img_u8 @ RW,  RH = (rh224 @ rh32) / 255,  RW = rw32^T @ rw224^T
    rh_np = (_resize_matrix(_MID, _OUT) @ _resize_matrix(H, _MID)) / 255.0   # (224, H)
    rw_np = _resize_matrix(W, _MID).T @ _resize_matrix(_MID, _OUT).T         # (W, 224)
    rh = jnp.asarray(rh_np.astype(np.float32))
    rw = jnp.asarray(rw_np.astype(np.float32))

    # Per-plane normalization constants, read from SMEM (no baked immediates).
    scale = jnp.asarray(np.tile(1.0 / STD, B).astype(np.float32))            # (P,)
    bias = jnp.asarray(np.tile(-MEAN / STD, B).astype(np.float32))           # (P,)

    out_size = jnp.dtype(out_dtype).itemsize
    vmem_need = (P * H * W                        # uint8 image
                 + (_OUT * H + W * _OUT) * 4      # resize matrices
                 + P * H * _OUT * 4               # f32 scratch
                 + P * _OUT * _OUT * out_size)    # output block
    if vmem_need > _VMEM_CEILING_BYTES:
        raise ValueError(
            f"Input {img_u8.shape} needs ~{vmem_need >> 20} MiB VMEM resident; "
            "add W-tiling / the factored 32x32 path for images this large.")

    compiler_kwargs = dict(dimension_semantics=("arbitrary",))
    if vmem_need > 12 * (1 << 20):
        # Raise the scoped-VMEM limit for moderately sized images (v5e default
        # is only 16 MiB); leave generous headroom but stay under v7x physical.
        compiler_kwargs["vmem_limit_bytes"] = min(
            int(vmem_need * 1.5) + (1 << 20), 60 * (1 << 20))

    flops = 2 * (P * H * W * _OUT + P * _OUT * H * _OUT)
    bytes_accessed = (P * H * W                      # uint8 input
                      + P * _OUT * _OUT * out_size   # output
                      + (_OUT * H + W * _OUT) * 4    # resize matrices
                      + 2 * P * 4)                   # norm constants

    out = pl.pallas_call(
        _preproc_kernel,
        out_shape=jax.ShapeDtypeStruct((P, _OUT, _OUT), out_dtype),
        grid=(1,),
        in_specs=[
            pl.BlockSpec((P * H, W), lambda i: (0, 0)),     # uint8 planes (resident)
            pl.BlockSpec((_OUT, H), lambda i: (0, 0)),      # RH (resident)
            pl.BlockSpec((W, _OUT), lambda i: (0, 0)),      # RW (resident)
            pl.BlockSpec(memory_space=pltpu.MemorySpace.SMEM),   # scale
            pl.BlockSpec(memory_space=pltpu.MemorySpace.SMEM),   # bias
        ],
        out_specs=pl.BlockSpec((P, _OUT, _OUT), lambda i: (0, 0, 0)),
        scratch_shapes=[pltpu.VMEM((P * H, _OUT), jnp.float32)],
        compiler_params=pltpu.CompilerParams(**compiler_kwargs),
        cost_estimate=pl.CostEstimate(
            flops=flops, transcendentals=0, bytes_accessed=bytes_accessed),
    )(x, rh, rw, scale, bias)

    return out.reshape(B, C, _OUT, _OUT)


def _reference(img_u8: jax.Array) -> jax.Array:
    """Pure-JAX reference of the same linear resize->resize->normalize pipeline."""
    B, C, H, W = img_u8.shape
    x = img_u8.astype(jnp.float32) / 255.0
    rh32 = jnp.asarray(_resize_matrix(H, _MID).astype(np.float32))      # (32, H)
    rw32 = jnp.asarray(_resize_matrix(W, _MID).astype(np.float32))      # (32, W)
    rh224 = jnp.asarray(_resize_matrix(_MID, _OUT).astype(np.float32))  # (224, 32)
    rw224 = jnp.asarray(_resize_matrix(_MID, _OUT).astype(np.float32))  # (224, 32)
    y = jnp.einsum('ph,nchw,qw->ncpq', rh32, x, rw32)                   # (N,C,32,32)
    y = jnp.einsum('ph,nchw,qw->ncpq', rh224, y, rw224)                 # (N,C,224,224)
    mean = jnp.asarray(MEAN[:C]).reshape(1, C, 1, 1)
    std = jnp.asarray(STD[:C]).reshape(1, C, 1, 1)
    return (y - mean) / std


if __name__ == "__main__":
    key = jax.random.PRNGKey(0)
    # Synthetic "PIL image": small 64x64 RGB, NCHW uint8 (no file reads).
    H_IN, W_IN = 64, 64
    img_u8 = jax.random.randint(
        key, (1, 3, H_IN, W_IN), 0, 256, dtype=jnp.int32).astype(jnp.uint8)

    out = sirena_preprocess(img_u8)
    jax.block_until_ready(out)

    assert out.shape == (1, 3, 224, 224), out.shape
    # NOTE: f32 approximation of torchvision (PIL's first Resize re-quantizes
    # to uint8 before ToTensor) — matches this linear-resize reference, not
    # bit-exact PIL output.
    ref = _reference(img_u8)
    np.testing.assert_allclose(np.asarray(out), np.asarray(ref),
                               rtol=2e-4, atol=3e-4)
    print("KERNEL_OK")
</pallas_src>

<mosaic_0001>
module attributes {stable_mosaic.version = 11 : i64} {
  func.func @_preproc_kernel(%arg0: i32, %arg1: memref<192x64xi8, #tpu.memory_space<vmem>>, %arg2: memref<224x64xf32, #tpu.memory_space<vmem>>, %arg3: memref<64x224xf32, #tpu.memory_space<vmem>>, %arg4: memref<3xf32, #tpu.memory_space<smem>>, %arg5: memref<3xf32, #tpu.memory_space<smem>>, %arg6: memref<3x224x224xf32, #tpu.memory_space<vmem>>, %arg7: memref<192x224xf32, #tpu.memory_space<vmem>>) attributes {dimension_semantics = [#tpu.dimension_semantics<arbitrary>], iteration_bounds = array<i64: 1>, scalar_prefetch = 0 : i64, scratch_operands = 1 : i64, tpu.core_type = #tpu.core_type<tc>, window_params = [{pipeline_mode = #tpu.pipeline_mode<synchronous>, transform_indices = @transform_0, window_bounds = array<i64: 192, 64>}, {pipeline_mode = #tpu.pipeline_mode<synchronous>, transform_indices = @transform_1, window_bounds = array<i64: 224, 64>}, {pipeline_mode = #tpu.pipeline_mode<synchronous>, transform_indices = @transform_2, window_bounds = array<i64: 64, 224>}, {transform_indices = @transform_3, window_bounds = array<i64: 3>}, {transform_indices = @transform_4, window_bounds = array<i64: 3>}, {pipeline_mode = #tpu.pipeline_mode<synchronous>, transform_indices = @transform_5, window_bounds = array<i64: 3, 224, 224>}]} {
    %c0 = arith.constant 0 : index
    %c0_0 = arith.constant 0 : index
    %0 = vector.load %arg1[%c0, %c0_0] : memref<192x64xi8, #tpu.memory_space<vmem>>, vector<192x64xi8>
    %1 = arith.uitofp %0 : vector<192x64xi8> to vector<192x64xf32>
    %c0_1 = arith.constant 0 : index
    %c0_2 = arith.constant 0 : index
    %2 = vector.load %arg3[%c0_1, %c0_2] : memref<64x224xf32, #tpu.memory_space<vmem>>, vector<64x224xf32>
    %cst = arith.constant dense<0.000000e+00> : vector<192x224xf32>
    %3 = tpu.matmul %1, %2, %cst {dimension_numbers = #tpu.dot_dimension_numbers<[1], [0], [0], [1], [0, 0, 1, 1], [], []>} : vector<192x64xf32>, vector<64x224xf32>, vector<192x224xf32> -> vector<192x224xf32>
    %c0_3 = arith.constant 0 : index
    %c0_4 = arith.constant 0 : index
    %4 = vector.load %arg7[%c0_3, %c0_4] : memref<192x224xf32, #tpu.memory_space<vmem>>, vector<192x224xf32>
    tpu.vector_store %arg7[%c0_3, %c0_4], %3 {strides = array<i32>} : memref<192x224xf32, #tpu.memory_space<vmem>>, vector<192x224xf32>,
    %c0_5 = arith.constant 0 : index
    %c0_6 = arith.constant 0 : index
    %5 = vector.load %arg2[%c0_5, %c0_6] : memref<224x64xf32, #tpu.memory_space<vmem>>, vector<224x64xf32>
    %c0_7 = arith.constant 0 : index
    %c0_8 = arith.constant 0 : index
    %6 = vector.load %arg7[%c0_7, %c0_8] : memref<192x224xf32, #tpu.memory_space<vmem>>, vector<64x224xf32>
    %cst_9 = arith.constant dense<0.000000e+00> : vector<224x224xf32>
    %7 = tpu.matmul %5, %6, %cst_9 {dimension_numbers = #tpu.dot_dimension_numbers<[1], [0], [0], [1], [0, 0, 1, 1], [], []>} : vector<224x64xf32>, vector<64x224xf32>, vector<224x224xf32> -> vector<224x224xf32>
    %c0_10 = arith.constant 0 : index
    %8 = memref.load %arg4[%c0_10] : memref<3xf32, #tpu.memory_space<smem>>
    %9 = vector.broadcast %8 : f32 to vector<224x224xf32>
    %10 = arith.mulf %7, %9 : vector<224x224xf32>
    %c0_11 = arith.constant 0 : index
    %11 = memref.load %arg5[%c0_11] : memref<3xf32, #tpu.memory_space<smem>>
    %12 = vector.broadcast %11 : f32 to vector<224x224xf32>
    %13 = arith.addf %10, %12 : vector<224x224xf32>
    %c0_12 = arith.constant 0 : index
    %c0_13 = arith.constant 0 : index
    %c0_14 = arith.constant 0 : index
    %14 = vector.load %arg6[%c0_12, %c0_13, %c0_14] : memref<3x224x224xf32, #tpu.memory_space<vmem>>, vector<1x224x224xf32>
    %15 = vector.shape_cast %14 : vector<1x224x224xf32> to vector<224x224xf32>
    %16 = vector.shape_cast %13 : vector<224x224xf32> to vector<1x224x224xf32>
    tpu.vector_store %arg6[%c0_12, %c0_13, %c0_14], %16 {strides = array<i32>} : memref<3x224x224xf32, #tpu.memory_space<vmem>>, vector<1x224x224xf32>,
    %c0_15 = arith.constant 0 : index
    %c0_16 = arith.constant 0 : index
    %17 = vector.load %arg2[%c0_15, %c0_16] : memref<224x64xf32, #tpu.memory_space<vmem>>, vector<224x64xf32>
    %c64 = arith.constant 64 : index
    %c0_17 = arith.constant 0 : index
    %18 = vector.load %arg7[%c64, %c0_17] : memref<192x224xf32, #tpu.memory_space<vmem>>, vector<64x224xf32>
    %cst_18 = arith.constant dense<0.000000e+00> : vector<224x224xf32>
    %19 = tpu.matmul %17, %18, %cst_18 {dimension_numbers = #tpu.dot_dimension_numbers<[1], [0], [0], [1], [0, 0, 1, 1], [], []>} : vector<224x64xf32>, vector<64x224xf32>, vector<224x224xf32> -> vector<224x224xf32>
    %c1 = arith.constant 1 : index
    %20 = memref.load %arg4[%c1] : memref<3xf32, #tpu.memory_space<smem>>
    %21 = vector.broadcast %20 : f32 to vector<224x224xf32>
    %22 = arith.mulf %19, %21 : vector<224x224xf32>
    %c1_19 = arith.constant 1 : index
    %23 = memref.load %arg5[%c1_19] : memref<3xf32, #tpu.memory_space<smem>>
    %24 = vector.broadcast %23 : f32 to vector<224x224xf32>
    %25 = arith.addf %22, %24 : vector<224x224xf32>
    %c1_20 = arith.constant 1 : index
    %c0_21 = arith.constant 0 : index
    %c0_22 = arith.constant 0 : index
    %26 = vector.load %arg6[%c1_20, %c0_21, %c0_22] : memref<3x224x224xf32, #tpu.memory_space<vmem>>, vector<1x224x224xf32>
    %27 = vector.shape_cast %26 : vector<1x224x224xf32> to vector<224x224xf32>
    %28 = vector.shape_cast %25 : vector<224x224xf32> to vector<1x224x224xf32>
    tpu.vector_store %arg6[%c1_20, %c0_21, %c0_22], %28 {strides = array<i32>} : memref<3x224x224xf32, #tpu.memory_space<vmem>>, vector<1x224x224xf32>,
    %c0_23 = arith.constant 0 : index
    %c0_24 = arith.constant 0 : index
    %29 = vector.load %arg2[%c0_23, %c0_24] : memref<224x64xf32, #tpu.memory_space<vmem>>, vector<224x64xf32>
    %c128 = arith.constant 128 : index
    %c0_25 = arith.constant 0 : index
    %30 = vector.load %arg7[%c128, %c0_25] : memref<192x224xf32, #tpu.memory_space<vmem>>, vector<64x224xf32>
    %cst_26 = arith.constant dense<0.000000e+00> : vector<224x224xf32>
    %31 = tpu.matmul %29, %30, %cst_26 {dimension_numbers = #tpu.dot_dimension_numbers<[1], [0], [0], [1], [0, 0, 1, 1], [], []>} : vector<224x64xf32>, vector<64x224xf32>, vector<224x224xf32> -> vector<224x224xf32>
    %c2 = arith.constant 2 : index
    %32 = memref.load %arg4[%c2] : memref<3xf32, #tpu.memory_space<smem>>
    %33 = vector.broadcast %32 : f32 to vector<224x224xf32>
    %34 = arith.mulf %31, %33 : vector<224x224xf32>
    %c2_27 = arith.constant 2 : index
    %35 = memref.load %arg5[%c2_27] : memref<3xf32, #tpu.memory_space<smem>>
    %36 = vector.broadcast %35 : f32 to vector<224x224xf32>
    %37 = arith.addf %34, %36 : vector<224x224xf32>
    %c2_28 = arith.constant 2 : index
    %c0_29 = arith.constant 0 : index
    %c0_30 = arith.constant 0 : index
    %38 = vector.load %arg6[%c2_28, %c0_29, %c0_30] : memref<3x224x224xf32, #tpu.memory_space<vmem>>, vector<1x224x224xf32>
    %39 = vector.shape_cast %38 : vector<1x224x224xf32> to vector<224x224xf32>
    %40 = vector.shape_cast %37 : vector<224x224xf32> to vector<1x224x224xf32>
    tpu.vector_store %arg6[%c2_28, %c0_29, %c0_30], %40 {strides = array<i32>} : memref<3x224x224xf32, #tpu.memory_space<vmem>>, vector<1x224x224xf32>,
    return
  }
  func.func @transform_0(%arg0: i32) -> (i32, i32) {
    %c0_i32 = arith.constant 0 : i32
    %c0_i32_0 = arith.constant 0 : i32
    %c0_i32_1 = arith.constant 0 : i32
    return %c0_i32, %c0_i32_0 : i32, i32
  }
  func.func @transform_1(%arg0: i32) -> (i32, i32) {
    %c0_i32 = arith.constant 0 : i32
    %c0_i32_0 = arith.constant 0 : i32
    %c0_i32_1 = arith.constant 0 : i32
    return %c0_i32, %c0_i32_0 : i32, i32
  }
  func.func @transform_2(%arg0: i32) -> (i32, i32) {
    %c0_i32 = arith.constant 0 : i32
    %c0_i32_0 = arith.constant 0 : i32
    %c0_i32_1 = arith.constant 0 : i32
    return %c0_i32, %c0_i32_0 : i32, i32
  }
  func.func @transform_3(%arg0: i32) -> i32 {
    %c0_i32 = arith.constant 0 : i32
    %c0_i32_0 = arith.constant 0 : i32
    return %c0_i32 : i32
  }
  func.func @transform_4(%arg0: i32) -> i32 {
    %c0_i32 = arith.constant 0 : i32
    %c0_i32_0 = arith.constant 0 : i32
    return %c0_i32 : i32
  }
  func.func @transform_5(%arg0: i32) -> (i32, i32, i32) {
    %c0_i32 = arith.constant 0 : i32
    %c0_i32_0 = arith.constant 0 : i32
    %c0_i32_1 = arith.constant 0 : i32
    %c0_i32_2 = arith.constant 0 : i32
    return %c0_i32, %c0_i32_0, %c0_i32_1 : i32, i32, i32
  }
}

</mosaic_0001>

<bundles_post_ra>
// kernel: tpu_custom_call.1
= control target key start
LH: loop header
LB: loop body
LE: loop exit
PB: predicated region body
PF: predicated region fallthrough
CT: control target
= control target key end

     0   :  { %10 = vsyncpa [#allocation5], 0  ;;  %s3379_s0 = inlined_call_operand.vmem [shape: u8[192,64], index: 0, kind: input, shape index: {}]   ;;  %s3380_s1 = inlined_call_operand.vmem [shape: f32[224,64], index: 1, kind: input, shape index: {}]   ;;  %s3381_s2 = inlined_call_operand.vmem [shape: f32[64,224], index: 2, kind: input, shape index: {}]   ;;  %s3382_s3 = inlined_call_operand.vmem [shape: f32[3], index: 3, kind: input, shape index: {}]   ;;  %s3383_s4 = inlined_call_operand.vmem [shape: f32[3], index: 4, kind: input, shape index: {}]   ;;  %s3384_s5 = inlined_call_operand.hbm [shape: f32[3,224,224], index: 5, kind: output, shape index: {}]  }
   0x1   :  { %11 = vsyncpa [#allocation7], 0 }
   0x2   :  { %12 = vsyncpa [#allocation4], 0  ;;  %s24_s20 = sshll.u32 %s3382_s3, 4  ;;  %s33_s23 = sshll.u32 %s3383_s4, 4  ;;  %s25_s20 = int_to_ptr.vmem [resolvable:$true] %s24_s20  ;;  %s34_s23 = int_to_ptr.vmem [resolvable:$true] %s33_s23 }
   0x3   :  { %s2263_s24 = smov [#allocation3]   ;;  %s2264_s25 = smov [#allocation6]  }
   0x4   :  { %27 = dma.vmem_to_smem %s25_s20, 16, %s2263_s24, [#allocation5]  }
   0x5   :  { %36 = dma.vmem_to_smem %s34_s23, 16, %s2264_s25, [#allocation7]  }
   0x6   :  { %2257 = dma.done.wait [#allocation5], 16  }
   0x7   :  { %2258 = vsyncadd [#allocation5], 4294967280 }
   0x8   :  { %2259 = dma.done.wait [#allocation7], 16  }
   0x9   :  { %2260 = vsyncadd [#allocation7], 4294967280 }
   0xa   :  { %45 = sfence }
   0xb   :  { %v138_v0 = vld [vmem:[%s3381_s2 + $0x70] sm:$0xff]  ;;  %v139_v1 = vld [vmem:[%s3381_s2 + $0x78] sm:$0xff]  ;;  %v136_v2 = vld [vmem:[%s3381_s2 + $0x60] sm:$0xff]  ;;  %vm140_vm0 = vcmask 523264   ;;  %vm392_vm1 = vcmask 785408   ;;  %s770_s17 = sld [smem:[#allocation3]] }
   0xc   :  { %221 = vmatpush.msra.mxu0 %v138_v0  ;;  %310 = vmatpush.msra.mxu1 %v139_v1  ;;  %v137_v3 = vld [vmem:[%s3381_s2 + $0x68] sm:$0xff]  ;;  %v134_v4 = vld [vmem:[%s3381_s2 + $0x50] sm:$0xff]  ;;  %v135_v5 = vld [vmem:[%s3381_s2 + $0x58] sm:$0xff]  ;;  %s828_s18 = sld [smem:[#allocation6]]  ;;  %s1954_s25 = sshll.u32 %s3384_s5, 4  ;;  %s1955_s25 = int_to_ptr.hbm [resolvable:$true] %s1954_s25 }
   0xd   :  { %v132_v6 = vld [vmem:[%s3381_s2 + $0x40] sm:$0xff]  ;;  %v133_v7 = vld [vmem:[%s3381_s2 + $0x48] sm:$0xff]  ;;  %v130_v9 = vld [vmem:[%s3381_s2 + $0x30] sm:$0xff]  ;;  %s2129_s15 = sld [smem:[#allocation6 + $0x1]]  ;;  %s2266_s26 = smov 256  }
   0xe   :  { %222 = vmatpush.msra.mxu0 %v136_v2  ;;  %311 = vmatpush.msra.mxu1 %v137_v3  ;;  %v46_v8 = vld [vmem:[%s3379_s0] sm:$0xff]  ;;  %v131_v10 = vld [vmem:[%s3381_s2 + $0x38] sm:$0xff]  ;;  %v129_v13 = vld [vmem:[%s3381_s2 + $0x28] sm:$0xff]  ;;  %s2186_s16 = sld [smem:[#allocation3 + $0x2]]  ;;  %s2267_s27 = smov 16  }
   0xf   :  { %v52_v11 = vunpack.c.0.s8 %v46_v8  ;;  %v128_v12 = vld [vmem:[%s3381_s2 + $0x20] sm:$0xff]  ;;  %v126_v15 = vld [vmem:[%s3381_s2 + $0x10] sm:$0xff]  ;;  %v127_v16 = vld [vmem:[%s3381_s2 + $0x18] sm:$0xff]  ;;  %v53_v20 = vunpack.c.1.s8 %v46_v8  ;;  %v54_v23 = vunpack.c.2.s8 %v46_v8  ;;  %v55_v26 = vunpack.c.3.s8 %v46_v8 }
  0x10   :  { %223 = vmatpush.msra.mxu0 %v134_v4  ;;  %312 = vmatpush.msra.mxu1 %v135_v5  ;;  %v124_v17 = vld [vmem:[%s3381_s2] sm:$0xff]  ;;  %v125_v18 = vld [vmem:[%s3381_s2 + $0x8] sm:$0xff]  ;;  %v48_v41 = vld [vmem:[%s3379_s0 + $0x10] sm:$0xff] }
  0x11   :  { %v76_v14 = vand.u32 255, %v52_v11  ;;  %v77_v21 = vand.u32 255, %v53_v20  ;;  %v78_v24 = vand.u32 255, %v54_v23  ;;  %v79_v27 = vand.u32 255, %v55_v26  ;;  %v47_v28 = vld [vmem:[%s3379_s0 + $0x8] sm:$0xff]  ;;  %v49_v54 = vld [vmem:[%s3379_s0 + $0x18] sm:$0xff] }
  0x12   :  { %224 = vmatpush.msra.mxu0 %v132_v6  ;;  %313 = vmatpush.msra.mxu1 %v133_v7  ;;  %v56_v30 = vunpack.c.0.s8 %v47_v28  ;;  %v57_v33 = vunpack.c.1.s8 %v47_v28  ;;  %v58_v36 = vunpack.c.2.s8 %v47_v28  ;;  %v59_v39 = vunpack.c.3.s8 %v47_v28  ;;  %v50_v3 = vld [vmem:[%s3379_s0 + $0x20] sm:$0xff] }
  0x13   :  { %v100_v19 = vcvt.s32.f32 %v76_v14  ;;  %v101_v22 = vcvt.s32.f32 %v77_v21  ;;  %v102_v25 = vcvt.s32.f32 %v78_v24  ;;  %v103_v29 = vcvt.s32.f32 %v79_v27 }
  0x14   :  { %225 = vmatpush.msra.mxu0 %v130_v9  ;;  %314 = vmatpush.msra.mxu1 %v131_v10  ;;  %v80_v31 = vand.u32 255, %v56_v30  ;;  %v81_v34 = vand.u32 255, %v57_v33  ;;  %v82_v37 = vand.u32 255, %v58_v36  ;;  %v83_v40 = vand.u32 255, %v59_v39 }
  0x15   :  { %v60_v43 = vunpack.c.0.s8 %v48_v41  ;;  %v61_v46 = vunpack.c.1.s8 %v48_v41  ;;  %v62_v49 = vunpack.c.2.s8 %v48_v41  ;;  %v63_v52 = vunpack.c.3.s8 %v48_v41 }
  0x16   :  { %226 = vmatpush.msra.mxu0 %v128_v12  ;;  %315 = vmatpush.msra.mxu1 %v129_v13  ;;  %v104_v32 = vcvt.s32.f32 %v80_v31  ;;  %v105_v35 = vcvt.s32.f32 %v81_v34  ;;  %v106_v38 = vcvt.s32.f32 %v82_v37  ;;  %v107_v42 = vcvt.s32.f32 %v83_v40 }
  0x17   :  { %v84_v44 = vand.u32 255, %v60_v43  ;;  %v85_v47 = vand.u32 255, %v61_v46  ;;  %v86_v50 = vand.u32 255, %v62_v49  ;;  %v87_v53 = vand.u32 255, %v63_v52 }
  0x18   :  { %227 = vmatpush.msra.mxu0 %v126_v15  ;;  %316 = vmatpush.msra.mxu1 %v127_v16  ;;  %v64_v56 = vunpack.c.0.s8 %v49_v54  ;;  %v65_v59 = vunpack.c.1.s8 %v49_v54  ;;  %v66_v62 = vunpack.c.2.s8 %v49_v54  ;;  %v67_v1 = vunpack.c.3.s8 %v49_v54  ;;  %v2444_v54 = vld [vmem:[%s3380_s1 + $0x10] sm:$0xff] }
  0x19   :  { %v108_v45 = vcvt.s32.f32 %v84_v44  ;;  %v109_v48 = vcvt.s32.f32 %v85_v47  ;;  %v110_v51 = vcvt.s32.f32 %v86_v50  ;;  %v111_v55 = vcvt.s32.f32 %v87_v53 }
  0x1a   :  { %228 = vmatpush.msra.mxu0 %v124_v17  ;;  %317 = vmatpush.msra.mxu1 %v125_v18  ;;  %v88_v57 = vand.u32 255, %v64_v56  ;;  %v89_v60 = vand.u32 255, %v65_v59  ;;  %v90_v63 = vand.u32 255, %v66_v62  ;;  %v91_v2 = vand.u32 255, %v67_v1 }
  0x1b   :  { %1968 = vmatmul.msk.f32.vlgmr.msra.gmra.mxu0 %vm140_vm0, %v100_v19  ;;  %1992 = vmatmul.msk.f32.vlgmr.msra.gmra.mxu1 %vm140_vm0, %v100_v19  ;;  %v68_v5 = vunpack.c.0.s8 %v50_v3  ;;  %v69_v8 = vunpack.c.1.s8 %v50_v3  ;;  %v70_v13 = vunpack.c.2.s8 %v50_v3  ;;  %v71_v18 = vunpack.c.3.s8 %v50_v3  ;;  %v2474_v3 = vld [vmem:[%s3380_s1 + $0x28] sm:$0xff] }
  0x1c   :  { %v112_v58 = vcvt.s32.f32 %v88_v57  ;;  %v113_v61 = vcvt.s32.f32 %v89_v60  ;;  %v114_v0 = vcvt.s32.f32 %v90_v63  ;;  %v115_v4 = vcvt.s32.f32 %v91_v2 }
  0x1d   :  { %v92_v6 = vand.u32 255, %v68_v5  ;;  %v93_v11 = vand.u32 255, %v69_v8  ;;  %v94_v16 = vand.u32 255, %v70_v13  ;;  %v95_v21 = vand.u32 255, %v71_v18 }
  0x1f   :  { %v116_v7 = vcvt.s32.f32 %v92_v6  ;;  %v117_v12 = vcvt.s32.f32 %v93_v11  ;;  %v118_v17 = vcvt.s32.f32 %v94_v16  ;;  %v119_v23 = vcvt.s32.f32 %v95_v21  ;;  %v2484_v6 = vld [vmem:[%s3380_s1 + $0x30] sm:$0xff] }
  0x23   :  { %1969 = vmatmul.msk.f32.gmra.mxu0 %vm140_vm0, %v101_v22  ;;  %1993 = vmatmul.msk.f32.gmra.mxu1 %vm140_vm0, %v101_v22  ;;  %v51_v22 = vld [vmem:[%s3379_s0 + $0x28] sm:$0xff]  ;;  %s2128_s0 = sld [smem:[#allocation3 + $0x1]] }
  0x24   :  { %v72_v24 = vunpack.c.0.s8 %v51_v22  ;;  %v74_v34 = vunpack.c.2.s8 %v51_v22  ;;  %v75_v39 = vunpack.c.3.s8 %v51_v22 }
  0x26   :  { %v96_v27 = vand.u32 255, %v72_v24  ;;  %v98_v37 = vand.u32 255, %v74_v34 }
  0x28   :  { %v120_v28 = vcvt.s32.f32 %v96_v27 }
  0x2b   :  { %1970 = vmatmul.msk.f32.gmra.mxu0 %vm140_vm0, %v102_v25  ;;  %1994 = vmatmul.msk.f32.gmra.mxu1 %vm140_vm0, %v102_v25 }
  0x33   :  { %1971 = vmatmul.msk.f32.gmra.mxu0 %vm140_vm0, %v103_v29  ;;  %1995 = vmatmul.msk.f32.gmra.mxu1 %vm140_vm0, %v103_v29  ;;  %v73_v29 = vunpack.c.1.s8 %v51_v22 }
  0x3b   :  { %1972 = vmatmul.msk.f32.gmra.mxu0 %vm140_vm0, %v104_v32  ;;  %1996 = vmatmul.msk.f32.gmra.mxu1 %vm140_vm0, %v104_v32  ;;  %v97_v32 = vand.u32 255, %v73_v29  ;;  %v2540_v29 = vld [vmem:[%s3380_s1 + $0x58] sm:$0xff] }
  0x3d   :  { %v121_v33 = vcvt.s32.f32 %v97_v32  ;;  %v2550_v32 = vld [vmem:[%s3380_s1 + $0x60] sm:$0xff] }
  0x43   :  { %1973 = vmatmul.msk.f32.gmra.mxu0 %vm140_vm0, %v105_v35  ;;  %1997 = vmatmul.msk.f32.gmra.mxu1 %vm140_vm0, %v105_v35 }
  0x4b   :  { %1974 = vmatmul.msk.f32.gmra.mxu0 %vm140_vm0, %v106_v38  ;;  %1998 = vmatmul.msk.f32.gmra.mxu1 %vm140_vm0, %v106_v38  ;;  %v122_v38 = vcvt.s32.f32 %v98_v37 }
  0x53   :  { %1975 = vmatmul.msk.f32.gmra.mxu0 %vm140_vm0, %v107_v42  ;;  %1999 = vmatmul.msk.f32.gmra.mxu1 %vm140_vm0, %v107_v42  ;;  %v99_v42 = vand.u32 255, %v75_v39 }
  0x55   :  { %v123_v43 = vcvt.s32.f32 %v99_v42 }
  0x5b   :  { %1976 = vmatmul.msk.f32.gmra.mxu0 %vm140_vm0, %v108_v45  ;;  %2000 = vmatmul.msk.f32.gmra.mxu1 %vm140_vm0, %v108_v45 }
  0x63   :  { %1977 = vmatmul.msk.f32.gmra.mxu0 %vm140_vm0, %v109_v48  ;;  %2001 = vmatmul.msk.f32.gmra.mxu1 %vm140_vm0, %v109_v48 }
  0x6b   :  { %1978 = vmatmul.msk.f32.gmra.mxu0 %vm140_vm0, %v110_v51  ;;  %2002 = vmatmul.msk.f32.gmra.mxu1 %vm140_vm0, %v110_v51 }
  0x73   :  { %1979 = vmatmul.msk.f32.gmra.mxu0 %vm140_vm0, %v111_v55  ;;  %2003 = vmatmul.msk.f32.gmra.mxu1 %vm140_vm0, %v111_v55 }
  0x7b   :  { %1980 = vmatmul.msk.f32.gmra.mxu0 %vm140_vm0, %v112_v58  ;;  %2004 = vmatmul.msk.f32.gmra.mxu1 %vm140_vm0, %v112_v58 }
  0x83   :  { %1981 = vmatmul.msk.f32.gmra.mxu0 %vm140_vm0, %v113_v61  ;;  %2005 = vmatmul.msk.f32.gmra.mxu1 %vm140_vm0, %v113_v61  ;;  %v2454_v61 = vld [vmem:[%s3380_s1 + $0x18] sm:$0xff] }
  0x8b   :  { %1982 = vmatmul.msk.f32.gmra.mxu0 %vm140_vm0, %v114_v0  ;;  %2006 = vmatmul.msk.f32.gmra.mxu1 %vm140_vm0, %v114_v0  ;;  %v2464_v0 = vld [vmem:[%s3380_s1 + $0x20] sm:$0xff] }
  0x93   :  { %1983 = vmatmul.msk.f32.gmra.mxu0 %vm140_vm0, %v115_v4  ;;  %2007 = vmatmul.msk.f32.gmra.mxu1 %vm140_vm0, %v115_v4 }
  0x98   :  { %v2399_v9 = vpop.f32.mrf.mxu0  ;;  %v319_v10 = vpop.f32.mrf.mxu1 }
  0x99   :  { %393 = vst.msk [vmem:[#allocation2 + $0x8] sm:$0xff] %vm392_vm1, %v319_v10 }
  0x9b   :  { %1984 = vmatmul.msk.f32.gmra.mxu0 %vm140_vm0, %v116_v7  ;;  %2008 = vmatmul.msk.f32.gmra.mxu1 %vm140_vm0, %v116_v7 }
  0xa0   :  { %v2404_v14 = vpop.f32.mrf.mxu0  ;;  %v322_v15 = vpop.f32.mrf.mxu1  ;;  %v469_v58 = vld [vmem:[#allocation2 + $0x8] sm:$0xff] }
  0xa1   :  { %395 = vst.msk [vmem:[#allocation2 + $0x18] sm:$0xff] %vm392_vm1, %v322_v15  ;;  %v2516_v15 = vld [vmem:[%s3380_s1 + $0x48] sm:$0xff] }
  0xa3   :  { %1985 = vmatmul.msk.f32.gmra.mxu0 %vm140_vm0, %v117_v12  ;;  %2009 = vmatmul.msk.f32.gmra.mxu1 %vm140_vm0, %v117_v12  ;;  %v2504_v12 = vld [vmem:[%s3380_s1 + $0x40] sm:$0xff] }
  0xa8   :  { %v2409_v19 = vpop.f32.mrf.mxu0  ;;  %v325_v20 = vpop.f32.mrf.mxu1  ;;  %v471_v57 = vld [vmem:[#allocation2 + $0x18] sm:$0xff] }
  0xa9   :  { %397 = vst.msk [vmem:[#allocation2 + $0x28] sm:$0xff] %vm392_vm1, %v325_v20 }
  0xab   :  { %1986 = vmatmul.msk.f32.gmra.mxu0 %vm140_vm0, %v118_v17  ;;  %2010 = vmatmul.msk.f32.gmra.mxu1 %vm140_vm0, %v118_v17 }
  0xb0   :  { %v239_v25 = vpop.f32.mrf.mxu0  ;;  %v328_v26 = vpop.f32.mrf.mxu1  ;;  %v473_v56 = vld [vmem:[#allocation2 + $0x28] sm:$0xff] }
  0xb1   :  { %399 = vst.msk [vmem:[#allocation2 + $0x38] sm:$0xff] %vm392_vm1, %v328_v26 }
  0xb3   :  { %1987 = vmatmul.msk.f32.gmra.mxu0 %vm140_vm0, %v119_v23  ;;  %2011 = vmatmul.msk.f32.gmra.mxu1 %vm140_vm0, %v119_v23  ;;  %v2530_v23 = vld [vmem:[%s3380_s1 + $0x50] sm:$0xff] }
  0xb8   :  { %v242_v30 = vpop.f32.mrf.mxu0  ;;  %v331_v31 = vpop.f32.mrf.mxu1  ;;  %v475_v55 = vld [vmem:[#allocation2 + $0x38] sm:$0xff] }
  0xb9   :  { %401 = vst.msk [vmem:[#allocation2 + $0x48] sm:$0xff] %vm392_vm1, %v331_v31 }
  0xbb   :  { %1988 = vmatmul.msk.f32.gmra.mxu0 %vm140_vm0, %v120_v28  ;;  %2012 = vmatmul.msk.f32.gmra.mxu1 %vm140_vm0, %v120_v28 }
  0xc0   :  { %v245_v35 = vpop.f32.mrf.mxu0  ;;  %v334_v36 = vpop.f32.mrf.mxu1  ;;  %v477_v51 = vld [vmem:[#allocation2 + $0x48] sm:$0xff] }
  0xc1   :  { %403 = vst.msk [vmem:[#allocation2 + $0x58] sm:$0xff] %vm392_vm1, %v334_v36 }
  0xc3   :  { %1989 = vmatmul.msk.f32.gmra.mxu0 %vm140_vm0, %v121_v33  ;;  %2013 = vmatmul.msk.f32.gmra.mxu1 %vm140_vm0, %v121_v33 }
  0xc8   :  { %v248_v40 = vpop.f32.mrf.mxu0  ;;  %v337_v41 = vpop.f32.mrf.mxu1  ;;  %v479_v50 = vld [vmem:[#allocation2 + $0x58] sm:$0xff] }
  0xc9   :  { %405 = vst.msk [vmem:[#allocation2 + $0x68] sm:$0xff] %vm392_vm1, %v337_v41  ;;  %v2580_v41 = vld [vmem:[%s3380_s1 + $0x78] sm:$0xff] }
  0xcb   :  { %1990 = vmatmul.msk.f32.gmra.mxu0 %vm140_vm0, %v122_v38  ;;  %2014 = vmatmul.msk.f32.gmra.mxu1 %vm140_vm0, %v122_v38  ;;  %v2570_v38 = vld [vmem:[%s3380_s1 + $0x70] sm:$0xff] }
  0xd0   :  { %v251_v44 = vpop.f32.mrf.mxu0  ;;  %v340_v45 = vpop.f32.mrf.mxu1  ;;  %v481_v49 = vld [vmem:[#allocation2 + $0x68] sm:$0xff] }
  0xd1   :  { %576 = vmatpush.msrb.mxu0 %v251_v44  ;;  %2188 = vmatpush.msra.mxu2 %v251_v44  ;;  %407 = vst.msk [vmem:[#allocation2 + $0x78] sm:$0xff] %vm392_vm1, %v340_v45  ;;  %v2592_v44 = vld [vmem:[%s3380_s1 + $0x80] sm:$0xff] }
  0xd3   :  { %1991 = vmatmul.msk.f32.gmra.mxu0 %vm140_vm0, %v123_v43  ;;  %2015 = vmatmul.msk.f32.gmra.mxu1 %vm140_vm0, %v123_v43 }
  0xd4   :  { %577 = vmatpush.msrb.mxu0 %v248_v40  ;;  %2189 = vmatpush.msra.mxu2 %v248_v40 }
  0xd6   :  { %578 = vmatpush.msrb.mxu0 %v245_v35  ;;  %2190 = vmatpush.msra.mxu2 %v245_v35  ;;  %v2560_v35 = vld [vmem:[%s3380_s1 + $0x68] sm:$0xff] }
  0xd8   :  { %v2432_v46 = vpop.f32.mrf.mxu0  ;;  %v343_v47 = vpop.f32.mrf.mxu1  ;;  %579 = vmatpush.msrb.mxu0 %v242_v30  ;;  %2191 = vmatpush.msra.mxu2 %v242_v30  ;;  %v483_v48 = vld [vmem:[#allocation2 + $0x78] sm:$0xff] }
  0xd9   :  { %409 = vst.msk [vmem:[#allocation2 + $0x88] sm:$0xff] %vm392_vm1, %v343_v47  ;;  %677 = vmatpush.msrb.mxu1 %v483_v48  ;;  %2196 = vmatpush.msra.mxu3 %v483_v48  ;;  %v2602_v47 = vld [vmem:[%s3380_s1 + $0x88] sm:$0xff] }
  0xda   :  { %580 = vmatpush.msrb.mxu0 %v239_v25  ;;  %2192 = vmatpush.msra.mxu2 %v239_v25 }
  0xdb   :  { %678 = vmatpush.msrb.mxu1 %v481_v49  ;;  %2197 = vmatpush.msra.mxu3 %v481_v49 }
  0xdc   :  { %581 = vmatpush.msrb.mxu0 %v2409_v19  ;;  %2193 = vmatpush.msra.mxu2 %v2409_v19 }
  0xdd   :  { %679 = vmatpush.msrb.mxu1 %v479_v50  ;;  %2198 = vmatpush.msra.mxu3 %v479_v50 }
  0xde   :  { %582 = vmatpush.msrb.mxu0 %v2404_v14  ;;  %2194 = vmatpush.msra.mxu2 %v2404_v14 }
  0xdf   :  { %680 = vmatpush.msrb.mxu1 %v477_v51  ;;  %2199 = vmatpush.msra.mxu3 %v477_v51 }
  0xe0   :  { %v2439_v52 = vpop.f32.mrf.mxu0  ;;  %v346_v53 = vpop.f32.mrf.mxu1  ;;  %583 = vmatpush.msrb.mxu0 %v2399_v9  ;;  %2195 = vmatpush.msra.mxu2 %v2399_v9  ;;  %v2494_v9 = vld [vmem:[%s3380_s1 + $0x38] sm:$0xff]  ;;  %v971_v26 = vld [vmem:[#allocation2 + $0x88] sm:$0xff] }
  0xe1   :  { %411 = vst.msk [vmem:[#allocation2 + $0x98] sm:$0xff] %vm392_vm1, %v346_v53  ;;  %681 = vmatpush.msrb.mxu1 %v475_v55  ;;  %2200 = vmatpush.msra.mxu3 %v475_v55  ;;  %v2617_v55 = vstv %s770_s17  ;;  %s2187_s17 = sld [smem:[#allocation6 + $0x2]] }
  0xe2   :  { %2018 = vmatmul.msk.f32.vlgmr.msra.gmra.mxu2 %vm140_vm0, %v2444_v54 }
  0xe3   :  { %682 = vmatpush.msrb.mxu1 %v473_v56  ;;  %2201 = vmatpush.msra.mxu3 %v473_v56 }
  0xe5   :  { %683 = vmatpush.msrb.mxu1 %v471_v57  ;;  %2202 = vmatpush.msra.mxu3 %v471_v57 }
  0xe7   :  { %684 = vmatpush.msrb.mxu1 %v469_v58  ;;  %2203 = vmatpush.msra.mxu3 %v469_v58  ;;  %v2619_v58 = vstv %s828_s18 }
  0xe8   :  { %v260_v59 = vpop.f32.mrf.mxu0  ;;  %v349_v60 = vpop.f32.mrf.mxu1  ;;  %2046 = vmatmul.msk.f32.vlgmr.msra.gmra.mxu3 %vm140_vm0, %v2444_v54  ;;  %v973_v25 = vld [vmem:[#allocation2 + $0x98] sm:$0xff] }
  0xe9   :  { %413 = vst.msk [vmem:[#allocation2 + $0xa8] sm:$0xff] %vm392_vm1, %v349_v60 }
  0xea   :  { %2019 = vmatmul.msk.f32.gmra.mxu2 %vm140_vm0, %v2454_v61 }
  0xf0   :  { %v263_v62 = vpop.f32.mrf.mxu0  ;;  %v352_v63 = vpop.f32.mrf.mxu1  ;;  %2047 = vmatmul.msk.f32.gmra.mxu3 %vm140_vm0, %v2454_v61  ;;  %v975_v24 = vld [vmem:[#allocation2 + $0xa8] sm:$0xff] }
  0xf1   :  { %415 = vst.msk [vmem:[#allocation2 + $0xb8] sm:$0xff] %vm392_vm1, %v352_v63 }
  0xf2   :  { %2020 = vmatmul.msk.f32.gmra.mxu2 %vm140_vm0, %v2464_v0 }
  0xf8   :  { %v266_v1 = vpop.f32.mrf.mxu0  ;;  %v355_v2 = vpop.f32.mrf.mxu1  ;;  %2048 = vmatmul.msk.f32.gmra.mxu3 %vm140_vm0, %v2464_v0  ;;  %v977_v20 = vld [vmem:[#allocation2 + $0xb8] sm:$0xff] }
  0xf9   :  { %417 = vst.msk [vmem:[#allocation2 + $0xc8] sm:$0xff] %vm392_vm1, %v355_v2 }
  0xfa   :  { %2021 = vmatmul.msk.f32.gmra.mxu2 %vm140_vm0, %v2474_v3 }
 0x100   :  { %v269_v4 = vpop.f32.mrf.mxu0  ;;  %v358_v5 = vpop.f32.mrf.mxu1  ;;  %2049 = vmatmul.msk.f32.gmra.mxu3 %vm140_vm0, %v2474_v3  ;;  %v979_v19 = vld [vmem:[#allocation2 + $0xc8] sm:$0xff] }
 0x101   :  { %419 = vst.msk [vmem:[#allocation2 + $0xd8] sm:$0xff] %vm392_vm1, %v358_v5 }
 0x102   :  { %2022 = vmatmul.msk.f32.gmra.mxu2 %vm140_vm0, %v2484_v6 }
 0x108   :  { %v272_v7 = vpop.f32.mrf.mxu0  ;;  %v361_v8 = vpop.f32.mrf.mxu1  ;;  %2050 = vmatmul.msk.f32.gmra.mxu3 %vm140_vm0, %v2484_v6  ;;  %v981_v18 = vld [vmem:[#allocation2 + $0xd8] sm:$0xff] }
 0x109   :  { %421 = vst.msk [vmem:[#allocation2 + $0xe8] sm:$0xff] %vm392_vm1, %v361_v8  ;;  %v2642_v8 = vld [vmem:[%s3380_s1 + $0xa0] sm:$0xff] }
 0x10a   :  { %2023 = vmatmul.msk.f32.gmra.mxu2 %vm140_vm0, %v2494_v9 }
 0x110   :  { %v275_v10 = vpop.f32.mrf.mxu0  ;;  %v364_v11 = vpop.f32.mrf.mxu1  ;;  %2051 = vmatmul.msk.f32.gmra.mxu3 %vm140_vm0, %v2494_v9  ;;  %v983_v17 = vld [vmem:[#allocation2 + $0xe8] sm:$0xff] }
 0x111   :  { %1078 = vmatpush.msra.mxu0 %v275_v10  ;;  %423 = vst.msk [vmem:[#allocation2 + $0xf8] sm:$0xff] %vm392_vm1, %v364_v11 }
 0x112   :  { %2024 = vmatmul.msk.f32.gmra.mxu2 %vm140_vm0, %v2504_v12 }
 0x113   :  { %1079 = vmatpush.msra.mxu0 %v272_v7 }
 0x115   :  { %1080 = vmatpush.msra.mxu0 %v269_v4 }
 0x117   :  { %1081 = vmatpush.msra.mxu0 %v266_v1 }
 0x118   :  { %v2511_v13 = vpop.f32.mrf.mxu0  ;;  %v367_v14 = vpop.f32.mrf.mxu1  ;;  %v985_v16 = vld [vmem:[#allocation2 + $0xf8] sm:$0xff]  ;;  %2052 = vmatmul.msk.f32.gmra.mxu3 %vm140_vm0, %v2504_v12 }
 0x119   :  { %1082 = vmatpush.msra.mxu0 %v263_v62  ;;  %425 = vst.msk [vmem:[#allocation2 + $0x108] sm:$0xff] %vm392_vm1, %v367_v14  ;;  %1179 = vmatpush.msra.mxu1 %v985_v16  ;;  %v2628_v62 = vld [vmem:[%s3380_s1 + $0x98] sm:$0xff] }
 0x11a   :  { %2025 = vmatmul.msk.f32.gmra.mxu2 %vm140_vm0, %v2516_v15 }
 0x11b   :  { %1083 = vmatpush.msra.mxu0 %v260_v59  ;;  %1180 = vmatpush.msra.mxu1 %v983_v17 }
 0x11d   :  { %1084 = vmatpush.msra.mxu0 %v2439_v52  ;;  %1181 = vmatpush.msra.mxu1 %v981_v18  ;;  %v2613_v52 = vld [vmem:[%s3380_s1 + $0x90] sm:$0xff]  ;;  %v2656_v18 = vld [vmem:[%s3380_s1 + $0xa8] sm:$0xff] }
 0x11f   :  { %1085 = vmatpush.msra.mxu0 %v2432_v46  ;;  %1182 = vmatpush.msra.mxu1 %v979_v19 }
 0x120   :  { %v2525_v21 = vpop.f32.mrf.mxu0  ;;  %v370_v22 = vpop.f32.mrf.mxu1  ;;  %2053 = vmatmul.msk.f32.gmra.mxu3 %vm140_vm0, %v2516_v15  ;;  %v1474_v56 = vld [vmem:[#allocation2 + $0x108] sm:$0xff] }
 0x121   :  { %427 = vst.msk [vmem:[#allocation2 + $0x118] sm:$0xff] %vm392_vm1, %v370_v22  ;;  %1183 = vmatpush.msra.mxu1 %v977_v20 }
 0x122   :  { %2026 = vmatmul.msk.f32.gmra.mxu2 %vm140_vm0, %v2530_v23 }
 0x123   :  { %1184 = vmatpush.msra.mxu1 %v975_v24 }
 0x125   :  { %1185 = vmatpush.msra.mxu1 %v973_v25 }
 0x127   :  { %1186 = vmatpush.msra.mxu1 %v971_v26  ;;  %v2670_v26 = vld [vmem:[%s3380_s1 + $0xb0] sm:$0xff] }
 0x128   :  { %v284_v27 = vpop.f32.mrf.mxu0  ;;  %v373_v28 = vpop.f32.mrf.mxu1  ;;  %2054 = vmatmul.msk.f32.gmra.mxu3 %vm140_vm0, %v2530_v23  ;;  %v1476_v53 = vld [vmem:[#allocation2 + $0x118] sm:$0xff] }
 0x129   :  { %429 = vst.msk [vmem:[#allocation2 + $0x128] sm:$0xff] %vm392_vm1, %v373_v28 }
 0x12a   :  { %2027 = vmatmul.msk.f32.gmra.mxu2 %vm140_vm0, %v2540_v29 }
 0x130   :  { %v287_v30 = vpop.f32.mrf.mxu0  ;;  %v376_v31 = vpop.f32.mrf.mxu1  ;;  %2055 = vmatmul.msk.f32.gmra.mxu3 %vm140_vm0, %v2540_v29  ;;  %v1478_v51 = vld [vmem:[#allocation2 + $0x128] sm:$0xff] }
 0x131   :  { %431 = vst.msk [vmem:[#allocation2 + $0x138] sm:$0xff] %vm392_vm1, %v376_v31 }
 0x132   :  { %2028 = vmatmul.msk.f32.gmra.mxu2 %vm140_vm0, %v2550_v32 }
 0x138   :  { %v290_v33 = vpop.f32.mrf.mxu0  ;;  %v379_v34 = vpop.f32.mrf.mxu1  ;;  %2056 = vmatmul.msk.f32.gmra.mxu3 %vm140_vm0, %v2550_v32  ;;  %v1480_v50 = vld [vmem:[#allocation2 + $0x138] sm:$0xff] }
 0x139   :  { %433 = vst.msk [vmem:[#allocation2 + $0x148] sm:$0xff] %vm392_vm1, %v379_v34 }
 0x13a   :  { %2029 = vmatmul.msk.f32.gmra.mxu2 %vm140_vm0, %v2560_v35 }
 0x140   :  { %v293_v36 = vpop.f32.mrf.mxu0  ;;  %v382_v37 = vpop.f32.mrf.mxu1  ;;  %2057 = vmatmul.msk.f32.gmra.mxu3 %vm140_vm0, %v2560_v35  ;;  %v1482_v49 = vld [vmem:[#allocation2 + $0x148] sm:$0xff] }
 0x141   :  { %435 = vst.msk [vmem:[#allocation2 + $0x158] sm:$0xff] %vm392_vm1, %v382_v37 }
 0x142   :  { %2030 = vmatmul.msk.f32.gmra.mxu2 %vm140_vm0, %v2570_v38 }
 0x148   :  { %v296_v39 = vpop.f32.mrf.mxu0  ;;  %v385_v40 = vpop.f32.mrf.mxu1  ;;  %2058 = vmatmul.msk.f32.gmra.mxu3 %vm140_vm0, %v2570_v38  ;;  %v1484_v48 = vld [vmem:[#allocation2 + $0x158] sm:$0xff] }
 0x149   :  { %437 = vst.msk [vmem:[#allocation2 + $0x168] sm:$0xff] %vm392_vm1, %v385_v40 }
 0x14a   :  { %2031 = vmatmul.msk.f32.gmra.mxu2 %vm140_vm0, %v2580_v41 }
 0x150   :  { %v299_v42 = vpop.f32.mrf.mxu0  ;;  %v388_v43 = vpop.f32.mrf.mxu1  ;;  %2059 = vmatmul.msk.f32.gmra.mxu3 %vm140_vm0, %v2580_v41  ;;  %v1486_v46 = vld [vmem:[#allocation2 + $0x168] sm:$0xff] }
 0x151   :  { %1581 = vmatpush.msrb.mxu2 %v299_v42  ;;  %439 = vst.msk [vmem:[#allocation2 + $0x178] sm:$0xff] %vm392_vm1, %v388_v43 }
 0x152   :  { %2032 = vmatmul.msk.f32.gmra.mxu2 %vm140_vm0, %v2592_v44 }
 0x153   :  { %1582 = vmatpush.msrb.mxu2 %v296_v39 }
 0x155   :  { %1583 = vmatpush.msrb.mxu2 %v293_v36  ;;  %v2684_v36 = vld [vmem:[%s3380_s1 + $0xb8] sm:$0xff] }
 0x157   :  { %1584 = vmatpush.msrb.mxu2 %v290_v33 }
 0x158   :  { %v1488_v45 = vld [vmem:[#allocation2 + $0x178] sm:$0xff]  ;;  %2060 = vmatmul.msk.f32.gmra.mxu3 %vm140_vm0, %v2592_v44 }
 0x159   :  { %1585 = vmatpush.msrb.mxu2 %v287_v30  ;;  %1682 = vmatpush.msrb.mxu3 %v1488_v45  ;;  %v2694_v45 = vld [vmem:[%s3380_s1] sm:$0xff] }
 0x15a   :  { %2033 = vmatmul.msk.f32.gmra.mxu2 %vm140_vm0, %v2602_v47  ;;  %2016 = vmatmul.msk.f32.vlgmr.msrb.gmra.mxu0 %vm140_vm0, %v2694_v45 }
 0x15b   :  { %1586 = vmatpush.msrb.mxu2 %v284_v27  ;;  %1683 = vmatpush.msrb.mxu3 %v1486_v46 }
 0x15c   :  { %2044 = vmatmul.msk.f32.vlgmr.msrb.gmra.mxu1 %vm140_vm0, %v2694_v45 }
 0x15d   :  { %1587 = vmatpush.msrb.mxu2 %v2525_v21  ;;  %1684 = vmatpush.msrb.mxu3 %v1484_v48  ;;  %v2707_v48 = vld [vmem:[%s3380_s1 + $0xc0] sm:$0xff] }
 0x15f   :  { %1588 = vmatpush.msrb.mxu2 %v2511_v13  ;;  %1685 = vmatpush.msrb.mxu3 %v1482_v49 }
 0x160   :  { %2061 = vmatmul.msk.f32.gmra.mxu3 %vm140_vm0, %v2602_v47 }
 0x161   :  { %1686 = vmatpush.msrb.mxu3 %v1480_v50 }
 0x162   :  { %2034 = vmatmul.msk.f32.gmra.mxu2 %vm140_vm0, %v2613_v52 }
 0x163   :  { %1687 = vmatpush.msrb.mxu3 %v1478_v51 }
 0x165   :  { %1688 = vmatpush.msrb.mxu3 %v1476_v53  ;;  %v591_v57 = vpop.f32.mrf.mxu2 }
 0x166   :  { %v776_v59 = vmul.f32 %v2617_v55, %v591_v57  ;;  %v2717_v57 = vld [vmem:[%s3380_s1 + $0x8] sm:$0xff] }
 0x167   :  { %1689 = vmatpush.msrb.mxu3 %v1474_v56  ;;  %2017 = vmatmul.msk.f32.gmra.mxu0 %vm140_vm0, %v2717_v57 }
 0x168   :  { %2062 = vmatmul.msk.f32.gmra.mxu3 %vm140_vm0, %v2613_v52  ;;  %v834_v60 = vadd.f32 %v2619_v58, %v776_v59  ;;  %2045 = vmatmul.msk.f32.gmra.mxu1 %vm140_vm0, %v2717_v57 }
 0x16a   :  { %890 = vst [vmem:[#allocation8 + $0x20] sm:$0xff] %v834_v60  ;;  %2035 = vmatmul.msk.f32.gmra.mxu2 %vm140_vm0, %v2628_v62  ;;  %v2730_v60 = vld [vmem:[%s3380_s1 + $0xc8] sm:$0xff] }
 0x16b   :  { %v692_v63 = vpop.f32.mrf.mxu3 }
 0x16c   :  { %v777_v1 = vmul.f32 %v2617_v55, %v692_v63 }
 0x16d   :  { %v594_v2 = vpop.f32.mrf.mxu2 }
 0x16e   :  { %v835_v4 = vadd.f32 %v2619_v58, %v777_v1  ;;  %v778_v5 = vmul.f32 %v2617_v55, %v594_v2 }
 0x16f   :  { %2072 = vmatmul.msk.f32.vlgmr.msra.gmra.mxu0 %vm140_vm0, %v2694_v45 }
 0x170   :  { %891 = vst.msk [vmem:[#allocation8 + $0x28] sm:$0xff] %vm392_vm1, %v835_v4  ;;  %2063 = vmatmul.msk.f32.gmra.mxu3 %vm140_vm0, %v2628_v62  ;;  %v836_v7 = vadd.f32 %v2619_v58, %v778_v5  ;;  %2100 = vmatmul.msk.f32.vlgmr.msra.gmra.mxu1 %vm140_vm0, %v2694_v45 }
 0x172   :  { %892 = vst [vmem:[#allocation8 + $0x30] sm:$0xff] %v836_v7  ;;  %2036 = vmatmul.msk.f32.gmra.mxu2 %vm140_vm0, %v2642_v8 }
 0x173   :  { %v695_v10 = vpop.f32.mrf.mxu3 }
 0x174   :  { %v779_v11 = vmul.f32 %v2617_v55, %v695_v10  ;;  %v2748_v10 = vld [vmem:[%s3380_s1 + $0xd0] sm:$0xff] }
 0x175   :  { %v597_v13 = vpop.f32.mrf.mxu2 }
 0x176   :  { %v837_v14 = vadd.f32 %v2619_v58, %v779_v11  ;;  %v780_v16 = vmul.f32 %v2617_v55, %v597_v13 }
 0x177   :  { %2073 = vmatmul.msk.f32.gmra.mxu0 %vm140_vm0, %v2717_v57 }
 0x178   :  { %893 = vst.msk [vmem:[#allocation8 + $0x38] sm:$0xff] %vm392_vm1, %v837_v14  ;;  %2064 = vmatmul.msk.f32.gmra.mxu3 %vm140_vm0, %v2642_v8  ;;  %v838_v17 = vadd.f32 %v2619_v58, %v780_v16  ;;  %2101 = vmatmul.msk.f32.gmra.mxu1 %vm140_vm0, %v2717_v57 }
 0x17a   :  { %894 = vst [vmem:[#allocation8 + $0x40] sm:$0xff] %v838_v17  ;;  %2037 = vmatmul.msk.f32.gmra.mxu2 %vm140_vm0, %v2656_v18 }
 0x17b   :  { %v698_v19 = vpop.f32.mrf.mxu3 }
 0x17c   :  { %v781_v20 = vmul.f32 %v2617_v55, %v698_v19 }
 0x17d   :  { %v600_v21 = vpop.f32.mrf.mxu2 }
 0x17e   :  { %v839_v22 = vadd.f32 %v2619_v58, %v781_v20  ;;  %v782_v24 = vmul.f32 %v2617_v55, %v600_v21  ;;  %v2766_v20 = vld [vmem:[%s3380_s1 + $0xd8] sm:$0xff] }
 0x17f   :  { %2074 = vmatmul.msk.f32.gmra.mxu0 %vm140_vm0, %v2444_v54 }
 0x180   :  { %895 = vst.msk [vmem:[#allocation8 + $0x48] sm:$0xff] %vm392_vm1, %v839_v22  ;;  %2065 = vmatmul.msk.f32.gmra.mxu3 %vm140_vm0, %v2656_v18  ;;  %v840_v25 = vadd.f32 %v2619_v58, %v782_v24  ;;  %2102 = vmatmul.msk.f32.gmra.mxu1 %vm140_vm0, %v2444_v54 }
 0x182   :  { %896 = vst [vmem:[#allocation8 + $0x50] sm:$0xff] %v840_v25  ;;  %2038 = vmatmul.msk.f32.gmra.mxu2 %vm140_vm0, %v2670_v26 }
 0x183   :  { %v701_v27 = vpop.f32.mrf.mxu3 }
 0x184   :  { %v783_v28 = vmul.f32 %v2617_v55, %v701_v27 }
 0x185   :  { %v603_v30 = vpop.f32.mrf.mxu2 }
 0x186   :  { %v841_v31 = vadd.f32 %v2619_v58, %v783_v28  ;;  %v784_v33 = vmul.f32 %v2617_v55, %v603_v30 }
 0x187   :  { %2075 = vmatmul.msk.f32.gmra.mxu0 %vm140_vm0, %v2454_v61 }
 0x188   :  { %897 = vst.msk [vmem:[#allocation8 + $0x58] sm:$0xff] %vm392_vm1, %v841_v31  ;;  %2066 = vmatmul.msk.f32.gmra.mxu3 %vm140_vm0, %v2670_v26  ;;  %v842_v34 = vadd.f32 %v2619_v58, %v784_v33  ;;  %2103 = vmatmul.msk.f32.gmra.mxu1 %vm140_vm0, %v2454_v61 }
 0x18a   :  { %898 = vst [vmem:[#allocation8 + $0x60] sm:$0xff] %v842_v34  ;;  %2039 = vmatmul.msk.f32.gmra.mxu2 %vm140_vm0, %v2684_v36 }
 0x18b   :  { %v704_v37 = vpop.f32.mrf.mxu3 }
 0x18c   :  { %v785_v39 = vmul.f32 %v2617_v55, %v704_v37 }
 0x18d   :  { %v606_v40 = vpop.f32.mrf.mxu2 }
 0x18e   :  { %v843_v42 = vadd.f32 %v2619_v58, %v785_v39  ;;  %v786_v43 = vmul.f32 %v2617_v55, %v606_v40 }
 0x18f   :  { %2076 = vmatmul.msk.f32.gmra.mxu0 %vm140_vm0, %v2464_v0 }
 0x190   :  { %899 = vst.msk [vmem:[#allocation8 + $0x68] sm:$0xff] %vm392_vm1, %v843_v42  ;;  %2067 = vmatmul.msk.f32.gmra.mxu3 %vm140_vm0, %v2684_v36  ;;  %v844_v46 = vadd.f32 %v2619_v58, %v786_v43  ;;  %2104 = vmatmul.msk.f32.gmra.mxu1 %vm140_vm0, %v2464_v0 }
 0x192   :  { %900 = vst [vmem:[#allocation8 + $0x70] sm:$0xff] %v844_v46  ;;  %2040 = vmatmul.msk.f32.gmra.mxu2 %vm140_vm0, %v2707_v48 }
 0x193   :  { %v707_v49 = vpop.f32.mrf.mxu3 }
 0x194   :  { %v787_v50 = vmul.f32 %v2617_v55, %v707_v49 }
 0x195   :  { %v609_v51 = vpop.f32.mrf.mxu2 }
 0x196   :  { %v845_v53 = vadd.f32 %v2619_v58, %v787_v50  ;;  %v788_v56 = vmul.f32 %v2617_v55, %v609_v51 }
 0x197   :  { %2077 = vmatmul.msk.f32.gmra.mxu0 %vm140_vm0, %v2474_v3 }
 0x198   :  { %901 = vst.msk [vmem:[#allocation8 + $0x78] sm:$0xff] %vm392_vm1, %v845_v53  ;;  %2068 = vmatmul.msk.f32.gmra.mxu3 %vm140_vm0, %v2707_v48  ;;  %v846_v59 = vadd.f32 %v2619_v58, %v788_v56  ;;  %2105 = vmatmul.msk.f32.gmra.mxu1 %vm140_vm0, %v2474_v3 }
 0x19a   :  { %902 = vst [vmem:[#allocation8 + $0x80] sm:$0xff] %v846_v59  ;;  %2041 = vmatmul.msk.f32.gmra.mxu2 %vm140_vm0, %v2730_v60 }
 0x19b   :  { %v710_v63 = vpop.f32.mrf.mxu3 }
 0x19c   :  { %v789_v1 = vmul.f32 %v2617_v55, %v710_v63 }
 0x19d   :  { %v612_v2 = vpop.f32.mrf.mxu2 }
 0x19e   :  { %v847_v4 = vadd.f32 %v2619_v58, %v789_v1  ;;  %v790_v5 = vmul.f32 %v2617_v55, %v612_v2 }
 0x19f   :  { %2078 = vmatmul.msk.f32.gmra.mxu0 %vm140_vm0, %v2484_v6 }
 0x1a0   :  { %903 = vst.msk [vmem:[#allocation8 + $0x88] sm:$0xff] %vm392_vm1, %v847_v4  ;;  %2069 = vmatmul.msk.f32.gmra.mxu3 %vm140_vm0, %v2730_v60  ;;  %v848_v7 = vadd.f32 %v2619_v58, %v790_v5  ;;  %2106 = vmatmul.msk.f32.gmra.mxu1 %vm140_vm0, %v2484_v6 }
 0x1a2   :  { %904 = vst [vmem:[#allocation8 + $0x90] sm:$0xff] %v848_v7  ;;  %2042 = vmatmul.msk.f32.gmra.mxu2 %vm140_vm0, %v2748_v10 }
 0x1a3   :  { %v713_v11 = vpop.f32.mrf.mxu3 }
 0x1a4   :  { %v791_v13 = vmul.f32 %v2617_v55, %v713_v11 }
 0x1a5   :  { %v615_v14 = vpop.f32.mrf.mxu2 }
 0x1a6   :  { %v849_v16 = vadd.f32 %v2619_v58, %v791_v13  ;;  %v792_v17 = vmul.f32 %v2617_v55, %v615_v14 }
 0x1a7   :  { %2079 = vmatmul.msk.f32.gmra.mxu0 %vm140_vm0, %v2494_v9 }
 0x1a8   :  { %905 = vst.msk [vmem:[#allocation8 + $0x98] sm:$0xff] %vm392_vm1, %v849_v16  ;;  %2070 = vmatmul.msk.f32.gmra.mxu3 %vm140_vm0, %v2748_v10  ;;  %v850_v19 = vadd.f32 %v2619_v58, %v792_v17  ;;  %2107 = vmatmul.msk.f32.gmra.mxu1 %vm140_vm0, %v2494_v9 }
 0x1aa   :  { %906 = vst [vmem:[#allocation8 + $0xa0] sm:$0xff] %v850_v19  ;;  %2043 = vmatmul.msk.f32.gmra.mxu2 %vm140_vm0, %v2766_v20 }
 0x1ab   :  { %v716_v21 = vpop.f32.mrf.mxu3 }
 0x1ac   :  { %v793_v22 = vmul.f32 %v2617_v55, %v716_v21 }
 0x1ad   :  { %v618_v24 = vpop.f32.mrf.mxu2 }
 0x1ae   :  { %v851_v25 = vadd.f32 %v2619_v58, %v793_v22  ;;  %v794_v27 = vmul.f32 %v2617_v55, %v618_v24 }
 0x1af   :  { %2080 = vmatmul.msk.f32.gmra.mxu0 %vm140_vm0, %v2504_v12 }
 0x1b0   :  { %907 = vst.msk [vmem:[#allocation8 + $0xa8] sm:$0xff] %vm392_vm1, %v851_v25  ;;  %2071 = vmatmul.msk.f32.gmra.mxu3 %vm140_vm0, %v2766_v20  ;;  %v852_v28 = vadd.f32 %v2619_v58, %v794_v27  ;;  %2108 = vmatmul.msk.f32.gmra.mxu1 %vm140_vm0, %v2504_v12 }
 0x1b2   :  { %908 = vst [vmem:[#allocation8 + $0xb0] sm:$0xff] %v852_v28  ;;  %2130 = vmatmul.msk.f32.vlgmr.msrb.gmra.mxu2 %vm140_vm0, %v2694_v45 }
 0x1b3   :  { %v719_v30 = vpop.f32.mrf.mxu3 }
 0x1b4   :  { %v795_v31 = vmul.f32 %v2617_v55, %v719_v30 }
 0x1b5   :  { %v621_v33 = vpop.f32.mrf.mxu2 }
 0x1b6   :  { %v853_v34 = vadd.f32 %v2619_v58, %v795_v31  ;;  %v796_v37 = vmul.f32 %v2617_v55, %v621_v33 }
 0x1b7   :  { %2081 = vmatmul.msk.f32.gmra.mxu0 %vm140_vm0, %v2516_v15 }
 0x1b8   :  { %909 = vst.msk [vmem:[#allocation8 + $0xb8] sm:$0xff] %vm392_vm1, %v853_v34  ;;  %2158 = vmatmul.msk.f32.vlgmr.msrb.gmra.mxu3 %vm140_vm0, %v2694_v45  ;;  %v854_v39 = vadd.f32 %v2619_v58, %v796_v37  ;;  %2109 = vmatmul.msk.f32.gmra.mxu1 %vm140_vm0, %v2516_v15 }
 0x1ba   :  { %910 = vst [vmem:[#allocation8 + $0xc0] sm:$0xff] %v854_v39  ;;  %2131 = vmatmul.msk.f32.gmra.mxu2 %vm140_vm0, %v2717_v57 }
 0x1bb   :  { %v722_v40 = vpop.f32.mrf.mxu3 }
 0x1bc   :  { %v797_v42 = vmul.f32 %v2617_v55, %v722_v40 }
 0x1bd   :  { %v624_v43 = vpop.f32.mrf.mxu2 }
 0x1be   :  { %v855_v46 = vadd.f32 %v2619_v58, %v797_v42  ;;  %v798_v49 = vmul.f32 %v2617_v55, %v624_v43 }
 0x1bf   :  { %2082 = vmatmul.msk.f32.gmra.mxu0 %vm140_vm0, %v2530_v23 }
 0x1c0   :  { %911 = vst.msk [vmem:[#allocation8 + $0xc8] sm:$0xff] %vm392_vm1, %v855_v46  ;;  %2159 = vmatmul.msk.f32.gmra.mxu3 %vm140_vm0, %v2717_v57  ;;  %v856_v45 = vadd.f32 %v2619_v58, %v798_v49  ;;  %2110 = vmatmul.msk.f32.gmra.mxu1 %vm140_vm0, %v2530_v23 }
 0x1c2   :  { %912 = vst [vmem:[#allocation8 + $0xd0] sm:$0xff] %v856_v45  ;;  %2132 = vmatmul.msk.f32.gmra.mxu2 %vm140_vm0, %v2444_v54 }
 0x1c3   :  { %v725_v50 = vpop.f32.mrf.mxu3 }
 0x1c4   :  { %v799_v51 = vmul.f32 %v2617_v55, %v725_v50 }
 0x1c5   :  { %v627_v53 = vpop.f32.mrf.mxu2 }
 0x1c6   :  { %v857_v56 = vadd.f32 %v2619_v58, %v799_v51  ;;  %v800_v59 = vmul.f32 %v2617_v55, %v627_v53 }
 0x1c7   :  { %2083 = vmatmul.msk.f32.gmra.mxu0 %vm140_vm0, %v2540_v29 }
 0x1c8   :  { %913 = vst.msk [vmem:[#allocation8 + $0xd8] sm:$0xff] %vm392_vm1, %v857_v56  ;;  %2160 = vmatmul.msk.f32.gmra.mxu3 %vm140_vm0, %v2444_v54  ;;  %v858_v57 = vadd.f32 %v2619_v58, %v800_v59  ;;  %2111 = vmatmul.msk.f32.gmra.mxu1 %vm140_vm0, %v2540_v29 }
 0x1ca   :  { %914 = vst [vmem:[#allocation8 + $0xe0] sm:$0xff] %v858_v57  ;;  %2133 = vmatmul.msk.f32.gmra.mxu2 %vm140_vm0, %v2454_v61 }
 0x1cb   :  { %v728_v63 = vpop.f32.mrf.mxu3 }
 0x1cc   :  { %v801_v1 = vmul.f32 %v2617_v55, %v728_v63 }
 0x1cd   :  { %v630_v2 = vpop.f32.mrf.mxu2 }
 0x1ce   :  { %v859_v4 = vadd.f32 %v2619_v58, %v801_v1  ;;  %v802_v5 = vmul.f32 %v2617_v55, %v630_v2 }
 0x1cf   :  { %2084 = vmatmul.msk.f32.gmra.mxu0 %vm140_vm0, %v2550_v32 }
 0x1d0   :  { %915 = vst.msk [vmem:[#allocation8 + $0xe8] sm:$0xff] %vm392_vm1, %v859_v4  ;;  %2161 = vmatmul.msk.f32.gmra.mxu3 %vm140_vm0, %v2454_v61  ;;  %v860_v54 = vadd.f32 %v2619_v58, %v802_v5  ;;  %2112 = vmatmul.msk.f32.gmra.mxu1 %vm140_vm0, %v2550_v32 }
 0x1d2   :  { %916 = vst [vmem:[#allocation8 + $0xf0] sm:$0xff] %v860_v54  ;;  %2134 = vmatmul.msk.f32.gmra.mxu2 %vm140_vm0, %v2464_v0 }
 0x1d3   :  { %v731_v7 = vpop.f32.mrf.mxu3 }
 0x1d4   :  { %v803_v11 = vmul.f32 %v2617_v55, %v731_v7 }
 0x1d5   :  { %v633_v14 = vpop.f32.mrf.mxu2 }
 0x1d6   :  { %v861_v13 = vadd.f32 %v2619_v58, %v803_v11  ;;  %v804_v16 = vmul.f32 %v2617_v55, %v633_v14 }
 0x1d7   :  { %2085 = vmatmul.msk.f32.gmra.mxu0 %vm140_vm0, %v2560_v35  ;;  %v585_v7 = vpop.f32.mrf.mxu0 }
 0x1d8   :  { %917 = vst.msk [vmem:[#allocation8 + $0xf8] sm:$0xff] %vm392_vm1, %v861_v13  ;;  %2162 = vmatmul.msk.f32.gmra.mxu3 %vm140_vm0, %v2464_v0  ;;  %v862_v61 = vadd.f32 %v2619_v58, %v804_v16  ;;  %2113 = vmatmul.msk.f32.gmra.mxu1 %vm140_vm0, %v2560_v35  ;;  %v772_v13 = vmul.f32 %v2617_v55, %v585_v7 }
 0x1d9   :  { %v686_v11 = vpop.f32.mrf.mxu1 }
 0x1da   :  { %918 = vst [vmem:[#allocation8 + $0x100] sm:$0xff] %v862_v61  ;;  %2135 = vmatmul.msk.f32.gmra.mxu2 %vm140_vm0, %v2474_v3  ;;  %v773_v14 = vmul.f32 %v2617_v55, %v686_v11 }
 0x1db   :  { %v734_v17 = vpop.f32.mrf.mxu3 }
 0x1dc   :  { %v805_v19 = vmul.f32 %v2617_v55, %v734_v17  ;;  %v830_v17 = vadd.f32 %v2619_v58, %v772_v13 }
 0x1dd   :  { %v636_v22 = vpop.f32.mrf.mxu2 }
 0x1de   :  { %v863_v21 = vadd.f32 %v2619_v58, %v805_v19  ;;  %v806_v24 = vmul.f32 %v2617_v55, %v636_v22  ;;  %v831_v19 = vadd.f32 %v2619_v58, %v773_v14  ;;  %886 = vst [vmem:[#allocation8] sm:$0xff] %v830_v17 }
 0x1df   :  { %2086 = vmatmul.msk.f32.gmra.mxu0 %vm140_vm0, %v2570_v38 }
 0x1e0   :  { %919 = vst.msk [vmem:[#allocation8 + $0x108] sm:$0xff] %vm392_vm1, %v863_v21  ;;  %2163 = vmatmul.msk.f32.gmra.mxu3 %vm140_vm0, %v2474_v3  ;;  %v864_v0 = vadd.f32 %v2619_v58, %v806_v24  ;;  %2114 = vmatmul.msk.f32.gmra.mxu1 %vm140_vm0, %v2570_v38 }
 0x1e1   :  { %887 = vst.msk [vmem:[#allocation8 + $0x8] sm:$0xff] %vm392_vm1, %v831_v19 }
 0x1e2   :  { %920 = vst [vmem:[#allocation8 + $0x110] sm:$0xff] %v864_v0  ;;  %2136 = vmatmul.msk.f32.gmra.mxu2 %vm140_vm0, %v2484_v6 }
 0x1e3   :  { %v737_v25 = vpop.f32.mrf.mxu3 }
 0x1e4   :  { %v807_v27 = vmul.f32 %v2617_v55, %v737_v25  ;;  %v588_v0 = vpop.f32.mrf.mxu0 }
 0x1e5   :  { %v639_v30 = vpop.f32.mrf.mxu2  ;;  %v689_v25 = vpop.f32.mrf.mxu1 }
 0x1e6   :  { %v865_v28 = vadd.f32 %v2619_v58, %v807_v27  ;;  %v808_v31 = vmul.f32 %v2617_v55, %v639_v30  ;;  %v774_v27 = vmul.f32 %v2617_v55, %v588_v0 }
 0x1e7   :  { %2087 = vmatmul.msk.f32.gmra.mxu0 %vm140_vm0, %v2580_v41 }
 0x1e8   :  { %921 = vst.msk [vmem:[#allocation8 + $0x118] sm:$0xff] %vm392_vm1, %v865_v28  ;;  %2164 = vmatmul.msk.f32.gmra.mxu3 %vm140_vm0, %v2484_v6  ;;  %v866_v3 = vadd.f32 %v2619_v58, %v808_v31  ;;  %2115 = vmatmul.msk.f32.gmra.mxu1 %vm140_vm0, %v2580_v41 }
 0x1ea   :  { %922 = vst [vmem:[#allocation8 + $0x120] sm:$0xff] %v866_v3  ;;  %2137 = vmatmul.msk.f32.gmra.mxu2 %vm140_vm0, %v2494_v9  ;;  %v832_v3 = vadd.f32 %v2619_v58, %v774_v27 }
 0x1eb   :  { %v740_v33 = vpop.f32.mrf.mxu3 }
 0x1ec   :  { %v809_v34 = vmul.f32 %v2617_v55, %v740_v33  ;;  %888 = vst [vmem:[#allocation8 + $0x10] sm:$0xff] %v832_v3  ;;  %v3026_v3 = vstv %s2187_s17 }
 0x1ed   :  { %v642_v39 = vpop.f32.mrf.mxu2 }
 0x1ee   :  { %v867_v37 = vadd.f32 %v2619_v58, %v809_v34  ;;  %v810_v40 = vmul.f32 %v2617_v55, %v642_v39 }
 0x1ef   :  { %2088 = vmatmul.msk.f32.gmra.mxu0 %vm140_vm0, %v2592_v44 }
 0x1f0   :  { %923 = vst.msk [vmem:[#allocation8 + $0x128] sm:$0xff] %vm392_vm1, %v867_v37  ;;  %2165 = vmatmul.msk.f32.gmra.mxu3 %vm140_vm0, %v2494_v9  ;;  %v868_v6 = vadd.f32 %v2619_v58, %v810_v40  ;;  %v2960_v37 = vstv %s2128_s0  ;;  %2116 = vmatmul.msk.f32.gmra.mxu1 %vm140_vm0, %v2592_v44 }
 0x1f2   :  { %924 = vst [vmem:[#allocation8 + $0x130] sm:$0xff] %v868_v6  ;;  %2138 = vmatmul.msk.f32.gmra.mxu2 %vm140_vm0, %v2504_v12  ;;  %v1087_v6 = vpop.f32.mrf.mxu0 }
 0x1f3   :  { %v743_v42 = vpop.f32.mrf.mxu3 }
 0x1f4   :  { %v811_v43 = vmul.f32 %v2617_v55, %v743_v42  ;;  %v2965_v42 = vstv %s2129_s15 }
 0x1f5   :  { %v645_v49 = vpop.f32.mrf.mxu2 }
 0x1f6   :  { %v869_v46 = vadd.f32 %v2619_v58, %v811_v43  ;;  %v812_v45 = vmul.f32 %v2617_v55, %v645_v49  ;;  %v1188_v43 = vpop.f32.mrf.mxu1 }
 0x1f7   :  { %2089 = vmatmul.msk.f32.gmra.mxu0 %vm140_vm0, %v2602_v47 }
 0x1f8   :  { %925 = vst.msk [vmem:[#allocation8 + $0x138] sm:$0xff] %vm392_vm1, %v869_v46  ;;  %2166 = vmatmul.msk.f32.gmra.mxu3 %vm140_vm0, %v2504_v12  ;;  %v870_v9 = vadd.f32 %v2619_v58, %v812_v45  ;;  %v1275_v46 = vmul.f32 %v2960_v37, %v1188_v43  ;;  %2117 = vmatmul.msk.f32.gmra.mxu1 %vm140_vm0, %v2602_v47 }
 0x1fa   :  { %926 = vst [vmem:[#allocation8 + $0x140] sm:$0xff] %v870_v9  ;;  %2139 = vmatmul.msk.f32.gmra.mxu2 %vm140_vm0, %v2516_v15 }
 0x1fb   :  { %v746_v50 = vpop.f32.mrf.mxu3 }
 0x1fc   :  { %v813_v51 = vmul.f32 %v2617_v55, %v746_v50 }
 0x1fd   :  { %v648_v56 = vpop.f32.mrf.mxu2 }
 0x1fe   :  { %v871_v53 = vadd.f32 %v2619_v58, %v813_v51  ;;  %v814_v59 = vmul.f32 %v2617_v55, %v648_v56  ;;  %v1333_v51 = vadd.f32 %v2965_v42, %v1275_v46 }
 0x1ff   :  { %2090 = vmatmul.msk.f32.gmra.mxu0 %vm140_vm0, %v2613_v52 }
 0x200   :  { %927 = vst.msk [vmem:[#allocation8 + $0x148] sm:$0xff] %vm392_vm1, %v871_v53  ;;  %2167 = vmatmul.msk.f32.gmra.mxu3 %vm140_vm0, %v2516_v15  ;;  %v872_v12 = vadd.f32 %v2619_v58, %v814_v59  ;;  %2118 = vmatmul.msk.f32.gmra.mxu1 %vm140_vm0, %v2613_v52 }
 0x201   :  { %1390 = vst.msk [vmem:[#allocation8 + $0x1c8] sm:$0xff] %vm392_vm1, %v1333_v51 }
 0x202   :  { %928 = vst [vmem:[#allocation8 + $0x150] sm:$0xff] %v872_v12  ;;  %2140 = vmatmul.msk.f32.gmra.mxu2 %vm140_vm0, %v2530_v23  ;;  %v1090_v12 = vpop.f32.mrf.mxu0 }
 0x203   :  { %v749_v57 = vpop.f32.mrf.mxu3 }
 0x204   :  { %v815_v63 = vmul.f32 %v2617_v55, %v749_v57  ;;  %v1191_v57 = vpop.f32.mrf.mxu1 }
 0x205   :  { %v651_v2 = vpop.f32.mrf.mxu2 }
 0x206   :  { %v873_v1 = vadd.f32 %v2619_v58, %v815_v63  ;;  %v816_v4 = vmul.f32 %v2617_v55, %v651_v2  ;;  %v1276_v63 = vmul.f32 %v2960_v37, %v1090_v12 }
 0x207   :  { %2091 = vmatmul.msk.f32.gmra.mxu0 %vm140_vm0, %v2628_v62 }
 0x208   :  { %929 = vst.msk [vmem:[#allocation8 + $0x158] sm:$0xff] %vm392_vm1, %v873_v1  ;;  %2168 = vmatmul.msk.f32.gmra.mxu3 %vm140_vm0, %v2530_v23  ;;  %v874_v15 = vadd.f32 %v2619_v58, %v816_v4  ;;  %v1277_v1 = vmul.f32 %v2960_v37, %v1191_v57  ;;  %2119 = vmatmul.msk.f32.gmra.mxu1 %vm140_vm0, %v2628_v62 }
 0x20a   :  { %930 = vst [vmem:[#allocation8 + $0x160] sm:$0xff] %v874_v15  ;;  %2141 = vmatmul.msk.f32.gmra.mxu2 %vm140_vm0, %v2540_v29  ;;  %v1334_v15 = vadd.f32 %v2965_v42, %v1276_v63  ;;  %v1093_v13 = vpop.f32.mrf.mxu0 }
 0x20b   :  { %v752_v5 = vpop.f32.mrf.mxu3 }
 0x20c   :  { %v817_v54 = vmul.f32 %v2617_v55, %v752_v5  ;;  %v1335_v5 = vadd.f32 %v2965_v42, %v1277_v1  ;;  %1391 = vst [vmem:[#allocation8 + $0x1d0] sm:$0xff] %v1334_v15  ;;  %v1194_v14 = vpop.f32.mrf.mxu1 }
 0x20d   :  { %v654_v61 = vpop.f32.mrf.mxu2 }
 0x20e   :  { %v875_v16 = vadd.f32 %v2619_v58, %v817_v54  ;;  %v818_v23 = vmul.f32 %v2617_v55, %v654_v61  ;;  %1392 = vst.msk [vmem:[#allocation8 + $0x1d8] sm:$0xff] %vm392_vm1, %v1335_v5  ;;  %v1279_v61 = vmul.f32 %v2960_v37, %v1194_v14 }
 0x20f   :  { %2092 = vmatmul.msk.f32.gmra.mxu0 %vm140_vm0, %v2642_v8 }
 0x210   :  { %931 = vst.msk [vmem:[#allocation8 + $0x168] sm:$0xff] %vm392_vm1, %v875_v16  ;;  %2169 = vmatmul.msk.f32.gmra.mxu3 %vm140_vm0, %v2540_v29  ;;  %v876_v21 = vadd.f32 %v2619_v58, %v818_v23  ;;  %v775_v29 = vmul.f32 %v2617_v55, %v689_v25  ;;  %v1278_v16 = vmul.f32 %v2960_v37, %v1093_v13  ;;  %v3021_v25 = vstv %s2186_s16 }
 0x211   :  { %2120 = vmatmul.msk.f32.gmra.mxu1 %vm140_vm0, %v2642_v8 }
 0x212   :  { %932 = vst [vmem:[#allocation8 + $0x170] sm:$0xff] %v876_v21  ;;  %2142 = vmatmul.msk.f32.gmra.mxu2 %vm140_vm0, %v2550_v32  ;;  %v833_v33 = vadd.f32 %v2619_v58, %v775_v29  ;;  %v1336_v19 = vadd.f32 %v2965_v42, %v1278_v16  ;;  %v1337_v21 = vadd.f32 %v2965_v42, %v1279_v61  ;;  %v1096_v27 = vpop.f32.mrf.mxu0 }
 0x213   :  { %v755_v22 = vpop.f32.mrf.mxu3 }
 0x214   :  { %v819_v24 = vmul.f32 %v2617_v55, %v755_v22  ;;  %889 = vst.msk [vmem:[#allocation8 + $0x18] sm:$0xff] %vm392_vm1, %v833_v33  ;;  %v1197_v29 = vpop.f32.mrf.mxu1 }
 0x215   :  { %v657_v30 = vpop.f32.mrf.mxu2  ;;  %1393 = vst [vmem:[#allocation8 + $0x1e0] sm:$0xff] %v1336_v19 }
 0x216   :  { %v877_v28 = vadd.f32 %v2619_v58, %v819_v24  ;;  %v820_v31 = vmul.f32 %v2617_v55, %v657_v30  ;;  %1394 = vst.msk [vmem:[#allocation8 + $0x1e8] sm:$0xff] %vm392_vm1, %v1337_v21 }
 0x217   :  { %2093 = vmatmul.msk.f32.gmra.mxu0 %vm140_vm0, %v2656_v18 }
 0x218   :  { %933 = vst.msk [vmem:[#allocation8 + $0x178] sm:$0xff] %vm392_vm1, %v877_v28  ;;  %2170 = vmatmul.msk.f32.gmra.mxu3 %vm140_vm0, %v2550_v32  ;;  %v878_v34 = vadd.f32 %v2619_v58, %v820_v31  ;;  %v1274_v32 = vmul.f32 %v2960_v37, %v1087_v6  ;;  %v1280_v28 = vmul.f32 %v2960_v37, %v1096_v27 }
 0x219   :  { %2121 = vmatmul.msk.f32.gmra.mxu1 %vm140_vm0, %v2656_v18 }
 0x21a   :  { %934 = vst [vmem:[#allocation8 + $0x180] sm:$0xff] %v878_v34  ;;  %2143 = vmatmul.msk.f32.gmra.mxu2 %vm140_vm0, %v2560_v35  ;;  %v1332_v50 = vadd.f32 %v2965_v42, %v1274_v32  ;;  %v1338_v34 = vadd.f32 %v2965_v42, %v1280_v28  ;;  %v1099_v6 = vpop.f32.mrf.mxu0 }
 0x21b   :  { %v758_v39 = vpop.f32.mrf.mxu3  ;;  %v1282_v32 = vmul.f32 %v2960_v37, %v1099_v6 }
 0x21c   :  { %v821_v40 = vmul.f32 %v2617_v55, %v758_v39  ;;  %1389 = vst [vmem:[#allocation8 + $0x1c0] sm:$0xff] %v1332_v50  ;;  %v1200_v43 = vpop.f32.mrf.mxu1 }
 0x21d   :  { %v660_v45 = vpop.f32.mrf.mxu2  ;;  %1395 = vst [vmem:[#allocation8 + $0x1f0] sm:$0xff] %v1338_v34  ;;  %v1283_v46 = vmul.f32 %v2960_v37, %v1200_v43 }
 0x21e   :  { %v879_v49 = vadd.f32 %v2619_v58, %v821_v40  ;;  %v822_v9 = vmul.f32 %v2617_v55, %v660_v45 }
 0x21f   :  { %v1341_v50 = vadd.f32 %v2965_v42, %v1283_v46  ;;  %2094 = vmatmul.msk.f32.gmra.mxu0 %vm140_vm0, %v2670_v26 }
 0x220   :  { %935 = vst.msk [vmem:[#allocation8 + $0x188] sm:$0xff] %vm392_vm1, %v879_v49  ;;  %2171 = vmatmul.msk.f32.gmra.mxu3 %vm140_vm0, %v2560_v35  ;;  %v880_v53 = vadd.f32 %v2619_v58, %v822_v9  ;;  %v1340_v9 = vadd.f32 %v2965_v42, %v1282_v32 }
 0x221   :  { %1398 = vst.msk [vmem:[#allocation8 + $0x208] sm:$0xff] %vm392_vm1, %v1341_v50  ;;  %2122 = vmatmul.msk.f32.gmra.mxu1 %vm140_vm0, %v2670_v26 }
 0x222   :  { %936 = vst [vmem:[#allocation8 + $0x190] sm:$0xff] %v880_v53  ;;  %2144 = vmatmul.msk.f32.gmra.mxu2 %vm140_vm0, %v2570_v38 }
 0x223   :  { %v761_v56 = vpop.f32.mrf.mxu3  ;;  %1397 = vst [vmem:[#allocation8 + $0x200] sm:$0xff] %v1340_v9 }
 0x224   :  { %v823_v59 = vmul.f32 %v2617_v55, %v761_v56  ;;  %v1203_v12 = vpop.f32.mrf.mxu1 }
 0x225   :  { %v663_v2 = vpop.f32.mrf.mxu2  ;;  %v1285_v63 = vmul.f32 %v2960_v37, %v1203_v12 }
 0x226   :  { %v881_v35 = vadd.f32 %v2619_v58, %v823_v59  ;;  %v824_v4 = vmul.f32 %v2617_v55, %v663_v2  ;;  %v1102_v59 = vpop.f32.mrf.mxu0 }
 0x227   :  { %v1284_v57 = vmul.f32 %v2960_v37, %v1102_v59  ;;  %2095 = vmatmul.msk.f32.gmra.mxu0 %vm140_vm0, %v2684_v36 }
 0x228   :  { %937 = vst.msk [vmem:[#allocation8 + $0x198] sm:$0xff] %vm392_vm1, %v881_v35  ;;  %2172 = vmatmul.msk.f32.gmra.mxu3 %vm140_vm0, %v2570_v38  ;;  %v882_v54 = vadd.f32 %v2619_v58, %v824_v4  ;;  %v1343_v4 = vadd.f32 %v2965_v42, %v1285_v63 }
 0x229   :  { %v1342_v2 = vadd.f32 %v2965_v42, %v1284_v57  ;;  %2123 = vmatmul.msk.f32.gmra.mxu1 %vm140_vm0, %v2684_v36 }
 0x22a   :  { %938 = vst [vmem:[#allocation8 + $0x1a0] sm:$0xff] %v882_v54  ;;  %2145 = vmatmul.msk.f32.gmra.mxu2 %vm140_vm0, %v2580_v41 }
 0x22b   :  { %v764_v7 = vpop.f32.mrf.mxu3  ;;  %1399 = vst [vmem:[#allocation8 + $0x210] sm:$0xff] %v1342_v2 }
 0x22c   :  { %v825_v11 = vmul.f32 %v2617_v55, %v764_v7  ;;  %1400 = vst.msk [vmem:[#allocation8 + $0x218] sm:$0xff] %vm392_vm1, %v1343_v4 }
 0x22d   :  { %v666_v23 = vpop.f32.mrf.mxu2 }
 0x22e   :  { %v883_v38 = vadd.f32 %v2619_v58, %v825_v11  ;;  %v826_v17 = vmul.f32 %v2617_v55, %v666_v23  ;;  %v1105_v7 = vpop.f32.mrf.mxu0  ;;  %v1206_v11 = vpop.f32.mrf.mxu1 }
 0x22f   :  { %v1286_v13 = vmul.f32 %v2960_v37, %v1105_v7  ;;  %v1287_v14 = vmul.f32 %v2960_v37, %v1206_v11  ;;  %2096 = vmatmul.msk.f32.gmra.mxu0 %vm140_vm0, %v2707_v48 }
 0x230   :  { %939 = vst.msk [vmem:[#allocation8 + $0x1a8] sm:$0xff] %vm392_vm1, %v883_v38  ;;  %2173 = vmatmul.msk.f32.gmra.mxu3 %vm140_vm0, %v2580_v41  ;;  %v884_v22 = vadd.f32 %v2619_v58, %v826_v17  ;;  %v1281_v41 = vmul.f32 %v2960_v37, %v1197_v29 }
 0x231   :  { %v1344_v38 = vadd.f32 %v2965_v42, %v1286_v13  ;;  %v1345_v23 = vadd.f32 %v2965_v42, %v1287_v14  ;;  %2124 = vmatmul.msk.f32.gmra.mxu1 %vm140_vm0, %v2707_v48 }
 0x232   :  { %940 = vst [vmem:[#allocation8 + $0x1b0] sm:$0xff] %v884_v22  ;;  %2146 = vmatmul.msk.f32.gmra.mxu2 %vm140_vm0, %v2592_v44  ;;  %v1339_v39 = vadd.f32 %v2965_v42, %v1281_v41 }
 0x233   :  { %v767_v24 = vpop.f32.mrf.mxu3  ;;  %1401 = vst [vmem:[#allocation8 + $0x220] sm:$0xff] %v1344_v38 }
 0x234   :  { %v827_v0 = vmul.f32 %v2617_v55, %v767_v24  ;;  %1396 = vst.msk [vmem:[#allocation8 + $0x1f8] sm:$0xff] %vm392_vm1, %v1339_v39 }
 0x235   :  { %v1590_v31 = vpop.f32.mrf.mxu2  ;;  %1402 = vst.msk [vmem:[#allocation8 + $0x228] sm:$0xff] %vm392_vm1, %v1345_v23 }
 0x236   :  { %v885_v30 = vadd.f32 %v2619_v58, %v827_v0  ;;  %v1777_v33 = vmul.f32 %v3021_v25, %v1590_v31  ;;  %v1108_v22 = vpop.f32.mrf.mxu0  ;;  %v1209_v24 = vpop.f32.mrf.mxu1 }
 0x237   :  { %v1288_v0 = vmul.f32 %v2960_v37, %v1108_v22  ;;  %v1289_v27 = vmul.f32 %v2960_v37, %v1209_v24  ;;  %2097 = vmatmul.msk.f32.gmra.mxu0 %vm140_vm0, %v2730_v60 }
 0x238   :  { %941 = vst.msk [vmem:[#allocation8 + $0x1b8] sm:$0xff] %vm392_vm1, %v885_v30  ;;  %2174 = vmatmul.msk.f32.gmra.mxu3 %vm140_vm0, %v2592_v44  ;;  %v1835_v55 = vadd.f32 %v3026_v3, %v1777_v33 }
 0x239   :  { %v1346_v41 = vadd.f32 %v2965_v42, %v1288_v0  ;;  %v1347_v30 = vadd.f32 %v2965_v42, %v1289_v27  ;;  %2125 = vmatmul.msk.f32.gmra.mxu1 %vm140_vm0, %v2730_v60 }
 0x23a   :  { %1892 = vst [vmem:[#allocation8 + $0x380] sm:$0xff] %v1835_v55  ;;  %2147 = vmatmul.msk.f32.gmra.mxu2 %vm140_vm0, %v2602_v47 }
 0x23b   :  { %v1691_v58 = vpop.f32.mrf.mxu3  ;;  %1403 = vst [vmem:[#allocation8 + $0x230] sm:$0xff] %v1346_v41 }
 0x23c   :  { %v1778_v40 = vmul.f32 %v3021_v25, %v1691_v58  ;;  %1404 = vst.msk [vmem:[#allocation8 + $0x238] sm:$0xff] %vm392_vm1, %v1347_v30 }
 0x23d   :  { %v1593_v49 = vpop.f32.mrf.mxu2 }
 0x23e   :  { %v1836_v44 = vadd.f32 %v3026_v3, %v1778_v40  ;;  %v1779_v45 = vmul.f32 %v3021_v25, %v1593_v49  ;;  %v1111_v39 = vpop.f32.mrf.mxu0  ;;  %v1212_v55 = vpop.f32.mrf.mxu1 }
 0x23f   :  { %v1290_v58 = vmul.f32 %v2960_v37, %v1111_v39  ;;  %v1291_v40 = vmul.f32 %v2960_v37, %v1212_v55 }
 0x240   :  { %1893 = vst.msk [vmem:[#allocation8 + $0x388] sm:$0xff] %vm392_vm1, %v1836_v44  ;;  %2175 = vmatmul.msk.f32.gmra.mxu3 %vm140_vm0, %v2602_v47  ;;  %v1837_v51 = vadd.f32 %v3026_v3, %v1779_v45 }
 0x241   :  { %v1348_v32 = vadd.f32 %v2965_v42, %v1290_v58  ;;  %v1349_v46 = vadd.f32 %v2965_v42, %v1291_v40 }
 0x242   :  { %1894 = vst [vmem:[#allocation8 + $0x390] sm:$0xff] %v1837_v51  ;;  %2148 = vmatmul.msk.f32.gmra.mxu2 %vm140_vm0, %v2613_v52 }
 0x243   :  { %v1694_v53 = vpop.f32.mrf.mxu3  ;;  %1405 = vst [vmem:[#allocation8 + $0x240] sm:$0xff] %v1348_v32 }
 0x244   :  { %v1780_v56 = vmul.f32 %v3021_v25, %v1694_v53  ;;  %1406 = vst.msk [vmem:[#allocation8 + $0x248] sm:$0xff] %vm392_vm1, %v1349_v46 }
 0x245   :  { %v1596_v1 = vpop.f32.mrf.mxu2 }
 0x246   :  { %v1838_v47 = vadd.f32 %v3026_v3, %v1780_v56  ;;  %v1781_v35 = vmul.f32 %v3021_v25, %v1596_v1  ;;  %v1114_v9 = vpop.f32.mrf.mxu0  ;;  %v1215_v50 = vpop.f32.mrf.mxu1 }
 0x247   :  { %v1292_v51 = vmul.f32 %v2960_v37, %v1114_v9  ;;  %v1293_v53 = vmul.f32 %v2960_v37, %v1215_v50 }
 0x248   :  { %1895 = vst.msk [vmem:[#allocation8 + $0x398] sm:$0xff] %vm392_vm1, %v1838_v47  ;;  %2176 = vmatmul.msk.f32.gmra.mxu3 %vm140_vm0, %v2613_v52  ;;  %v1839_v15 = vadd.f32 %v3026_v3, %v1781_v35 }
 0x249   :  { %v1350_v12 = vadd.f32 %v2965_v42, %v1292_v51  ;;  %v1351_v57 = vadd.f32 %v2965_v42, %v1293_v53 }
 0x24a   :  { %1896 = vst [vmem:[#allocation8 + $0x3a0] sm:$0xff] %v1839_v15  ;;  %2149 = vmatmul.msk.f32.gmra.mxu2 %vm140_vm0, %v2628_v62 }
 0x24b   :  { %v1697_v5 = vpop.f32.mrf.mxu3  ;;  %1407 = vst [vmem:[#allocation8 + $0x250] sm:$0xff] %v1350_v12 }
 0x24c   :  { %v1782_v54 = vmul.f32 %v3021_v25, %v1697_v5  ;;  %1408 = vst.msk [vmem:[#allocation8 + $0x258] sm:$0xff] %vm392_vm1, %v1351_v57 }
 0x24d   :  { %v1599_v16 = vpop.f32.mrf.mxu2 }
 0x24e   :  { %v1840_v52 = vadd.f32 %v3026_v3, %v1782_v54  ;;  %v1783_v61 = vmul.f32 %v3021_v25, %v1599_v16  ;;  %v1117_v35 = vpop.f32.mrf.mxu0  ;;  %v1218_v2 = vpop.f32.mrf.mxu1  ;;  %v968_v54 = vld [vmem:[%s3380_s1 + $0xd0] sm:$0xff] }
 0x24f   :  { %v1294_v4 = vmul.f32 %v2960_v37, %v1117_v35  ;;  %v1295_v15 = vmul.f32 %v2960_v37, %v1218_v2  ;;  %2098 = vmatmul.msk.f32.gmra.mxu0 %vm140_vm0, %v968_v54  ;;  %2126 = vmatmul.msk.f32.gmra.mxu1 %vm140_vm0, %v968_v54 }
 0x250   :  { %1897 = vst.msk [vmem:[#allocation8 + $0x3a8] sm:$0xff] %vm392_vm1, %v1840_v52  ;;  %2177 = vmatmul.msk.f32.gmra.mxu3 %vm140_vm0, %v2628_v62  ;;  %v1841_v17 = vadd.f32 %v3026_v3, %v1783_v61 }
 0x251   :  { %v1352_v11 = vadd.f32 %v2965_v42, %v1294_v4  ;;  %v1353_v13 = vadd.f32 %v2965_v42, %v1295_v15 }
 0x252   :  { %1898 = vst [vmem:[#allocation8 + $0x3b0] sm:$0xff] %v1841_v17  ;;  %2150 = vmatmul.msk.f32.gmra.mxu2 %vm140_vm0, %v2642_v8 }
 0x253   :  { %v1700_v19 = vpop.f32.mrf.mxu3  ;;  %1409 = vst [vmem:[#allocation8 + $0x260] sm:$0xff] %v1352_v11 }
 0x254   :  { %v1784_v21 = vmul.f32 %v3021_v25, %v1700_v19  ;;  %1410 = vst.msk [vmem:[#allocation8 + $0x268] sm:$0xff] %vm392_vm1, %v1353_v13 }
 0x255   :  { %v1602_v29 = vpop.f32.mrf.mxu2 }
 0x256   :  { %v1842_v62 = vadd.f32 %v3026_v3, %v1784_v21  ;;  %v1785_v28 = vmul.f32 %v3021_v25, %v1602_v29  ;;  %v1120_v61 = vpop.f32.mrf.mxu0  ;;  %v1221_v38 = vpop.f32.mrf.mxu1  ;;  %v969_v21 = vld [vmem:[%s3380_s1 + $0xd8] sm:$0xff]  ;;  %s2265_s1 = smov [#allocation8]  }
 0x257   :  { %v1296_v23 = vmul.f32 %v2960_v37, %v1120_v61  ;;  %v1297_v17 = vmul.f32 %v2960_v37, %v1221_v38  ;;  %2099 = vmatmul.msk.f32.gmra.mxu0 %vm140_vm0, %v969_v21  ;;  %2127 = vmatmul.msk.f32.gmra.mxu1 %vm140_vm0, %v969_v21  ;;  %s1952_s22 = sshll.u32 %s2265_s1, 4  ;;  %s1953_s22 = int_to_ptr.vmem [resolvable:$true] %s1952_s22 }
 0x258   :  { %1899 = vst.msk [vmem:[#allocation8 + $0x3b8] sm:$0xff] %vm392_vm1, %v1842_v62  ;;  %2178 = vmatmul.msk.f32.gmra.mxu3 %vm140_vm0, %v2642_v8  ;;  %v1843_v31 = vadd.f32 %v3026_v3, %v1785_v28 }
 0x259   :  { %v1354_v24 = vadd.f32 %v2965_v42, %v1296_v23  ;;  %v1355_v0 = vadd.f32 %v2965_v42, %v1297_v17 }
 0x25a   :  { %1900 = vst [vmem:[#allocation8 + $0x3c0] sm:$0xff] %v1843_v31  ;;  %2151 = vmatmul.msk.f32.gmra.mxu2 %vm140_vm0, %v2656_v18 }
 0x25b   :  { %v1703_v33 = vpop.f32.mrf.mxu3  ;;  %1411 = vst [vmem:[#allocation8 + $0x270] sm:$0xff] %v1354_v24 }
 0x25c   :  { %v1786_v34 = vmul.f32 %v3021_v25, %v1703_v33  ;;  %1412 = vst.msk [vmem:[#allocation8 + $0x278] sm:$0xff] %vm392_vm1, %v1355_v0 }
 0x25d   :  { %v1605_v6 = vpop.f32.mrf.mxu2 }
 0x25e   :  { %v1844_v8 = vadd.f32 %v3026_v3, %v1786_v34  ;;  %v1787_v43 = vmul.f32 %v3021_v25, %v1605_v6  ;;  %v1123_v28 = vpop.f32.mrf.mxu0  ;;  %v1224_v41 = vpop.f32.mrf.mxu1 }
 0x25f   :  { %v1298_v30 = vmul.f32 %v2960_v37, %v1123_v28  ;;  %v1299_v31 = vmul.f32 %v2960_v37, %v1224_v41 }
 0x260   :  { %1901 = vst.msk [vmem:[#allocation8 + $0x3c8] sm:$0xff] %vm392_vm1, %v1844_v8  ;;  %2179 = vmatmul.msk.f32.gmra.mxu3 %vm140_vm0, %v2656_v18  ;;  %v1845_v44 = vadd.f32 %v3026_v3, %v1787_v43 }
 0x261   :  { %v1356_v39 = vadd.f32 %v2965_v42, %v1298_v30  ;;  %v1357_v55 = vadd.f32 %v2965_v42, %v1299_v31 }
 0x262   :  { %1902 = vst [vmem:[#allocation8 + $0x3d0] sm:$0xff] %v1845_v44  ;;  %2152 = vmatmul.msk.f32.gmra.mxu2 %vm140_vm0, %v2670_v26 }
 0x263   :  { %v1706_v49 = vpop.f32.mrf.mxu3  ;;  %1413 = vst [vmem:[#allocation8 + $0x280] sm:$0xff] %v1356_v39 }
 0x264   :  { %v1788_v45 = vmul.f32 %v3021_v25, %v1706_v49  ;;  %1414 = vst.msk [vmem:[#allocation8 + $0x288] sm:$0xff] %vm392_vm1, %v1357_v55 }
 0x265   :  { %v1608_v56 = vpop.f32.mrf.mxu2 }
 0x266   :  { %v1846_v18 = vadd.f32 %v3026_v3, %v1788_v45  ;;  %v1789_v59 = vmul.f32 %v3021_v25, %v1608_v56  ;;  %v1126_v6 = vpop.f32.mrf.mxu0  ;;  %v1227_v43 = vpop.f32.mrf.mxu1 }
 0x267   :  { %v1300_v32 = vmul.f32 %v2960_v37, %v1126_v6  ;;  %v1301_v46 = vmul.f32 %v2960_v37, %v1227_v43 }
 0x268   :  { %1903 = vst.msk [vmem:[#allocation8 + $0x3d8] sm:$0xff] %vm392_vm1, %v1846_v18  ;;  %2180 = vmatmul.msk.f32.gmra.mxu3 %vm140_vm0, %v2670_v26  ;;  %v1847_v63 = vadd.f32 %v3026_v3, %v1789_v59 }
 0x269   :  { %v1358_v45 = vadd.f32 %v2965_v42, %v1300_v32  ;;  %v1359_v9 = vadd.f32 %v2965_v42, %v1301_v46 }
 0x26a   :  { %1904 = vst [vmem:[#allocation8 + $0x3e0] sm:$0xff] %v1847_v63  ;;  %2153 = vmatmul.msk.f32.gmra.mxu2 %vm140_vm0, %v2684_v36 }
 0x26b   :  { %v1709_v47 = vpop.f32.mrf.mxu3  ;;  %1415 = vst [vmem:[#allocation8 + $0x290] sm:$0xff] %v1358_v45 }
 0x26c   :  { %v1790_v1 = vmul.f32 %v3021_v25, %v1709_v47  ;;  %1416 = vst.msk [vmem:[#allocation8 + $0x298] sm:$0xff] %vm392_vm1, %v1359_v9 }
 0x26d   :  { %v1611_v5 = vpop.f32.mrf.mxu2 }
 0x26e   :  { %v1848_v26 = vadd.f32 %v3026_v3, %v1790_v1  ;;  %v1791_v7 = vmul.f32 %v3021_v25, %v1611_v5  ;;  %v1129_v18 = vpop.f32.mrf.mxu0  ;;  %v1230_v56 = vpop.f32.mrf.mxu1 }
 0x26f   :  { %v1302_v59 = vmul.f32 %v2960_v37, %v1129_v18  ;;  %v1303_v12 = vmul.f32 %v2960_v37, %v1230_v56 }
 0x270   :  { %1905 = vst.msk [vmem:[#allocation8 + $0x3e8] sm:$0xff] %vm392_vm1, %v1848_v26  ;;  %2181 = vmatmul.msk.f32.gmra.mxu3 %vm140_vm0, %v2684_v36  ;;  %v1849_v14 = vadd.f32 %v3026_v3, %v1791_v7 }
 0x271   :  { %v1360_v47 = vadd.f32 %v2965_v42, %v1302_v59  ;;  %v1361_v1 = vadd.f32 %v2965_v42, %v1303_v12 }
 0x272   :  { %1906 = vst [vmem:[#allocation8 + $0x3f0] sm:$0xff] %v1849_v14  ;;  %2154 = vmatmul.msk.f32.gmra.mxu2 %vm140_vm0, %v2707_v48 }
 0x273   :  { %v1712_v52 = vpop.f32.mrf.mxu3  ;;  %1417 = vst [vmem:[#allocation8 + $0x2a0] sm:$0xff] %v1360_v47 }
 0x274   :  { %v1792_v16 = vmul.f32 %v3021_v25, %v1712_v52  ;;  %1418 = vst.msk [vmem:[#allocation8 + $0x2a8] sm:$0xff] %vm392_vm1, %v1361_v1 }
 0x275   :  { %v1614_v19 = vpop.f32.mrf.mxu2 }
 0x276   :  { %v1850_v36 = vadd.f32 %v3026_v3, %v1792_v16  ;;  %v1793_v22 = vmul.f32 %v3021_v25, %v1614_v19  ;;  %v1132_v15 = vpop.f32.mrf.mxu0  ;;  %v1233_v26 = vpop.f32.mrf.mxu1 }
 0x277   :  { %v1304_v5 = vmul.f32 %v2960_v37, %v1132_v15  ;;  %v1305_v54 = vmul.f32 %v2960_v37, %v1233_v26 }
 0x278   :  { %1907 = vst.msk [vmem:[#allocation8 + $0x3f8] sm:$0xff] %vm392_vm1, %v1850_v36  ;;  %2182 = vmatmul.msk.f32.gmra.mxu3 %vm140_vm0, %v2707_v48  ;;  %v1851_v27 = vadd.f32 %v3026_v3, %v1793_v22 }
 0x279   :  { %v1362_v13 = vadd.f32 %v2965_v42, %v1304_v5  ;;  %v1363_v14 = vadd.f32 %v2965_v42, %v1305_v54 }
 0x27a   :  { %1908 = vst [vmem:[#allocation8 + $0x400] sm:$0xff] %v1851_v27  ;;  %2155 = vmatmul.msk.f32.gmra.mxu2 %vm140_vm0, %v2730_v60 }
 0x27b   :  { %v1715_v62 = vpop.f32.mrf.mxu3  ;;  %1419 = vst [vmem:[#allocation8 + $0x2b0] sm:$0xff] %v1362_v13 }
 0x27c   :  { %v1794_v29 = vmul.f32 %v3021_v25, %v1715_v62  ;;  %1420 = vst.msk [vmem:[#allocation8 + $0x2b8] sm:$0xff] %vm392_vm1, %v1363_v14 }
 0x27d   :  { %v1617_v33 = vpop.f32.mrf.mxu2 }
 0x27e   :  { %v1852_v48 = vadd.f32 %v3026_v3, %v1794_v29  ;;  %v1795_v34 = vmul.f32 %v3021_v25, %v1617_v33  ;;  %v1135_v38 = vpop.f32.mrf.mxu0  ;;  %v1236_v23 = vpop.f32.mrf.mxu1 }
 0x27f   :  { %v1306_v17 = vmul.f32 %v2960_v37, %v1135_v38  ;;  %v1307_v36 = vmul.f32 %v2960_v37, %v1236_v23 }
 0x280   :  { %1909 = vst.msk [vmem:[#allocation8 + $0x408] sm:$0xff] %vm392_vm1, %v1852_v48  ;;  %2183 = vmatmul.msk.f32.gmra.mxu3 %vm140_vm0, %v2730_v60  ;;  %v1853_v58 = vadd.f32 %v3026_v3, %v1795_v34 }
 0x281   :  { %v1364_v24 = vadd.f32 %v2965_v42, %v1306_v17  ;;  %v1365_v0 = vadd.f32 %v2965_v42, %v1307_v36 }
 0x282   :  { %1910 = vst [vmem:[#allocation8 + $0x410] sm:$0xff] %v1853_v58  ;;  %2156 = vmatmul.msk.f32.gmra.mxu2 %vm140_vm0, %v2748_v10 }
 0x283   :  { %v1718_v40 = vpop.f32.mrf.mxu3  ;;  %1421 = vst [vmem:[#allocation8 + $0x2c0] sm:$0xff] %v1364_v24 }
 0x284   :  { %v1796_v8 = vmul.f32 %v3021_v25, %v1718_v40  ;;  %1422 = vst.msk [vmem:[#allocation8 + $0x2c8] sm:$0xff] %vm392_vm1, %v1365_v0 }
 0x285   :  { %v1620_v44 = vpop.f32.mrf.mxu2 }
 0x286   :  { %v1854_v60 = vadd.f32 %v3026_v3, %v1796_v8  ;;  %v1797_v49 = vmul.f32 %v3021_v25, %v1620_v44  ;;  %v1138_v28 = vpop.f32.mrf.mxu0  ;;  %v1239_v41 = vpop.f32.mrf.mxu1 }
 0x287   :  { %v1308_v30 = vmul.f32 %v2960_v37, %v1138_v28  ;;  %v1309_v31 = vmul.f32 %v2960_v37, %v1239_v41 }
 0x288   :  { %1911 = vst.msk [vmem:[#allocation8 + $0x418] sm:$0xff] %vm392_vm1, %v1854_v60  ;;  %2184 = vmatmul.msk.f32.gmra.mxu3 %vm140_vm0, %v2748_v10  ;;  %v1855_v50 = vadd.f32 %v3026_v3, %v1797_v49 }
 0x289   :  { %v1366_v39 = vadd.f32 %v2965_v42, %v1308_v30  ;;  %v1367_v55 = vadd.f32 %v2965_v42, %v1309_v31 }
 0x28a   :  { %1912 = vst [vmem:[#allocation8 + $0x420] sm:$0xff] %v1855_v50  ;;  %2157 = vmatmul.msk.f32.gmra.mxu2 %vm140_vm0, %v2766_v20 }
 0x28b   :  { %v1721_v51 = vpop.f32.mrf.mxu3  ;;  %1423 = vst [vmem:[#allocation8 + $0x2d0] sm:$0xff] %v1366_v39 }
 0x28c   :  { %v1798_v53 = vmul.f32 %v3021_v25, %v1721_v51  ;;  %1424 = vst.msk [vmem:[#allocation8 + $0x2d8] sm:$0xff] %vm392_vm1, %v1367_v55 }
 0x28d   :  { %v1623_v57 = vpop.f32.mrf.mxu2 }
 0x28e   :  { %v1856_v10 = vadd.f32 %v3026_v3, %v1798_v53  ;;  %v1799_v63 = vmul.f32 %v3021_v25, %v1623_v57  ;;  %v1141_v6 = vpop.f32.mrf.mxu0  ;;  %v1242_v43 = vpop.f32.mrf.mxu1 }
 0x28f   :  { %v1310_v32 = vmul.f32 %v2960_v37, %v1141_v6  ;;  %v1311_v46 = vmul.f32 %v2960_v37, %v1242_v43 }
 0x290   :  { %1913 = vst.msk [vmem:[#allocation8 + $0x428] sm:$0xff] %vm392_vm1, %v1856_v10  ;;  %2185 = vmatmul.msk.f32.gmra.mxu3 %vm140_vm0, %v2766_v20  ;;  %v1857_v35 = vadd.f32 %v3026_v3, %v1799_v63 }
 0x291   :  { %v1368_v45 = vadd.f32 %v2965_v42, %v1310_v32  ;;  %v1369_v9 = vadd.f32 %v2965_v42, %v1311_v46 }
 0x292   :  { %1914 = vst [vmem:[#allocation8 + $0x430] sm:$0xff] %v1857_v35 }
 0x293   :  { %v1724_v2 = vpop.f32.mrf.mxu3  ;;  %1425 = vst [vmem:[#allocation8 + $0x2e0] sm:$0xff] %v1368_v45 }
 0x294   :  { %v1800_v4 = vmul.f32 %v3021_v25, %v1724_v2  ;;  %1426 = vst.msk [vmem:[#allocation8 + $0x2e8] sm:$0xff] %vm392_vm1, %v1369_v9 }
 0x295   :  { %v1626_v11 = vpop.f32.mrf.mxu2 }
 0x296   :  { %v1858_v7 = vadd.f32 %v3026_v3, %v1800_v4  ;;  %v1801_v20 = vmul.f32 %v3021_v25, %v1626_v11  ;;  %v1144_v18 = vpop.f32.mrf.mxu0  ;;  %v1245_v56 = vpop.f32.mrf.mxu1 }
 0x297   :  { %v1312_v59 = vmul.f32 %v2960_v37, %v1144_v18  ;;  %v1313_v12 = vmul.f32 %v2960_v37, %v1245_v56 }
 0x298   :  { %1915 = vst.msk [vmem:[#allocation8 + $0x438] sm:$0xff] %vm392_vm1, %v1858_v7  ;;  %v1859_v52 = vadd.f32 %v3026_v3, %v1801_v20 }
 0x299   :  { %v1370_v47 = vadd.f32 %v2965_v42, %v1312_v59  ;;  %v1371_v1 = vadd.f32 %v2965_v42, %v1313_v12 }
 0x29a   :  { %1916 = vst [vmem:[#allocation8 + $0x440] sm:$0xff] %v1859_v52 }
 0x29b   :  { %v1727_v16 = vpop.f32.mrf.mxu3  ;;  %1427 = vst [vmem:[#allocation8 + $0x2f0] sm:$0xff] %v1370_v47 }
 0x29c   :  { %v1802_v61 = vmul.f32 %v3021_v25, %v1727_v16  ;;  %1428 = vst.msk [vmem:[#allocation8 + $0x2f8] sm:$0xff] %vm392_vm1, %v1371_v1 }
 0x29d   :  { %v1629_v21 = vpop.f32.mrf.mxu2 }
 0x29e   :  { %v1860_v19 = vadd.f32 %v3026_v3, %v1802_v61  ;;  %v1803_v22 = vmul.f32 %v3021_v25, %v1629_v21  ;;  %v1147_v15 = vpop.f32.mrf.mxu0  ;;  %v1248_v26 = vpop.f32.mrf.mxu1 }
 0x29f   :  { %v1314_v5 = vmul.f32 %v2960_v37, %v1147_v15  ;;  %v1315_v54 = vmul.f32 %v2960_v37, %v1248_v26 }
 0x2a0   :  { %1917 = vst.msk [vmem:[#allocation8 + $0x448] sm:$0xff] %vm392_vm1, %v1860_v19  ;;  %v1861_v27 = vadd.f32 %v3026_v3, %v1803_v22 }
 0x2a1   :  { %v1372_v13 = vadd.f32 %v2965_v42, %v1314_v5  ;;  %v1373_v14 = vadd.f32 %v2965_v42, %v1315_v54 }
 0x2a2   :  { %1918 = vst [vmem:[#allocation8 + $0x450] sm:$0xff] %v1861_v27 }
 0x2a3   :  { %v1730_v62 = vpop.f32.mrf.mxu3  ;;  %1429 = vst [vmem:[#allocation8 + $0x300] sm:$0xff] %v1372_v13 }
 0x2a4   :  { %v1804_v29 = vmul.f32 %v3021_v25, %v1730_v62  ;;  %1430 = vst.msk [vmem:[#allocation8 + $0x308] sm:$0xff] %vm392_vm1, %v1373_v14 }
 0x2a5   :  { %v1632_v33 = vpop.f32.mrf.mxu2 }
 0x2a6   :  { %v1862_v48 = vadd.f32 %v3026_v3, %v1804_v29  ;;  %v1805_v34 = vmul.f32 %v3021_v25, %v1632_v33  ;;  %v1150_v38 = vpop.f32.mrf.mxu0  ;;  %v1251_v23 = vpop.f32.mrf.mxu1 }
 0x2a7   :  { %v1316_v17 = vmul.f32 %v2960_v37, %v1150_v38  ;;  %v1317_v36 = vmul.f32 %v2960_v37, %v1251_v23 }
 0x2a8   :  { %1919 = vst.msk [vmem:[#allocation8 + $0x458] sm:$0xff] %vm392_vm1, %v1862_v48  ;;  %v1863_v58 = vadd.f32 %v3026_v3, %v1805_v34 }
 0x2a9   :  { %v1374_v24 = vadd.f32 %v2965_v42, %v1316_v17  ;;  %v1375_v0 = vadd.f32 %v2965_v42, %v1317_v36 }
 0x2aa   :  { %1920 = vst [vmem:[#allocation8 + $0x460] sm:$0xff] %v1863_v58 }
 0x2ab   :  { %v1733_v40 = vpop.f32.mrf.mxu3  ;;  %1431 = vst [vmem:[#allocation8 + $0x310] sm:$0xff] %v1374_v24 }
 0x2ac   :  { %v1806_v8 = vmul.f32 %v3021_v25, %v1733_v40  ;;  %1432 = vst.msk [vmem:[#allocation8 + $0x318] sm:$0xff] %vm392_vm1, %v1375_v0 }
 0x2ad   :  { %v1635_v44 = vpop.f32.mrf.mxu2 }
 0x2ae   :  { %v1864_v60 = vadd.f32 %v3026_v3, %v1806_v8  ;;  %v1807_v49 = vmul.f32 %v3021_v25, %v1635_v44  ;;  %v1153_v28 = vpop.f32.mrf.mxu0  ;;  %v1254_v41 = vpop.f32.mrf.mxu1 }
 0x2af   :  { %v1318_v30 = vmul.f32 %v2960_v37, %v1153_v28  ;;  %v1319_v31 = vmul.f32 %v2960_v37, %v1254_v41 }
 0x2b0   :  { %1921 = vst.msk [vmem:[#allocation8 + $0x468] sm:$0xff] %vm392_vm1, %v1864_v60  ;;  %v1865_v50 = vadd.f32 %v3026_v3, %v1807_v49 }
 0x2b1   :  { %v1376_v39 = vadd.f32 %v2965_v42, %v1318_v30  ;;  %v1377_v55 = vadd.f32 %v2965_v42, %v1319_v31 }
 0x2b2   :  { %1922 = vst [vmem:[#allocation8 + $0x470] sm:$0xff] %v1865_v50 }
 0x2b3   :  { %v1736_v51 = vpop.f32.mrf.mxu3  ;;  %1433 = vst [vmem:[#allocation8 + $0x320] sm:$0xff] %v1376_v39 }
 0x2b4   :  { %v1808_v53 = vmul.f32 %v3021_v25, %v1736_v51  ;;  %1434 = vst.msk [vmem:[#allocation8 + $0x328] sm:$0xff] %vm392_vm1, %v1377_v55 }
 0x2b5   :  { %v1638_v57 = vpop.f32.mrf.mxu2 }
 0x2b6   :  { %v1866_v10 = vadd.f32 %v3026_v3, %v1808_v53  ;;  %v1809_v63 = vmul.f32 %v3021_v25, %v1638_v57  ;;  %v1156_v6 = vpop.f32.mrf.mxu0  ;;  %v1257_v43 = vpop.f32.mrf.mxu1 }
 0x2b7   :  { %v1320_v32 = vmul.f32 %v2960_v37, %v1156_v6  ;;  %v1321_v46 = vmul.f32 %v2960_v37, %v1257_v43 }
 0x2b8   :  { %1923 = vst.msk [vmem:[#allocation8 + $0x478] sm:$0xff] %vm392_vm1, %v1866_v10  ;;  %v1867_v35 = vadd.f32 %v3026_v3, %v1809_v63 }
 0x2b9   :  { %v1378_v45 = vadd.f32 %v2965_v42, %v1320_v32  ;;  %v1379_v9 = vadd.f32 %v2965_v42, %v1321_v46 }
 0x2ba   :  { %1924 = vst [vmem:[#allocation8 + $0x480] sm:$0xff] %v1867_v35 }
 0x2bb   :  { %v1739_v2 = vpop.f32.mrf.mxu3  ;;  %1435 = vst [vmem:[#allocation8 + $0x330] sm:$0xff] %v1378_v45 }
 0x2bc   :  { %v1810_v4 = vmul.f32 %v3021_v25, %v1739_v2  ;;  %1436 = vst.msk [vmem:[#allocation8 + $0x338] sm:$0xff] %vm392_vm1, %v1379_v9 }
 0x2bd   :  { %v1641_v11 = vpop.f32.mrf.mxu2 }
 0x2be   :  { %v1868_v7 = vadd.f32 %v3026_v3, %v1810_v4  ;;  %v1811_v20 = vmul.f32 %v3021_v25, %v1641_v11  ;;  %v1159_v18 = vpop.f32.mrf.mxu0  ;;  %v1260_v56 = vpop.f32.mrf.mxu1 }
 0x2bf   :  { %v1322_v59 = vmul.f32 %v2960_v37, %v1159_v18  ;;  %v1323_v12 = vmul.f32 %v2960_v37, %v1260_v56 }
 0x2c0   :  { %1925 = vst.msk [vmem:[#allocation8 + $0x488] sm:$0xff] %vm392_vm1, %v1868_v7  ;;  %v1869_v52 = vadd.f32 %v3026_v3, %v1811_v20 }
 0x2c1   :  { %v1380_v47 = vadd.f32 %v2965_v42, %v1322_v59  ;;  %v1381_v1 = vadd.f32 %v2965_v42, %v1323_v12 }
 0x2c2   :  { %1926 = vst [vmem:[#allocation8 + $0x490] sm:$0xff] %v1869_v52 }
 0x2c3   :  { %v1742_v16 = vpop.f32.mrf.mxu3  ;;  %1437 = vst [vmem:[#allocation8 + $0x340] sm:$0xff] %v1380_v47 }
 0x2c4   :  { %v1812_v61 = vmul.f32 %v3021_v25, %v1742_v16  ;;  %1438 = vst.msk [vmem:[#allocation8 + $0x348] sm:$0xff] %vm392_vm1, %v1381_v1 }
 0x2c5   :  { %v1644_v21 = vpop.f32.mrf.mxu2 }
 0x2c6   :  { %v1870_v19 = vadd.f32 %v3026_v3, %v1812_v61  ;;  %v1813_v22 = vmul.f32 %v3021_v25, %v1644_v21  ;;  %v1162_v15 = vpop.f32.mrf.mxu0  ;;  %v1263_v26 = vpop.f32.mrf.mxu1 }
 0x2c7   :  { %v1324_v5 = vmul.f32 %v2960_v37, %v1162_v15  ;;  %v1325_v54 = vmul.f32 %v2960_v37, %v1263_v26 }
 0x2c8   :  { %1927 = vst.msk [vmem:[#allocation8 + $0x498] sm:$0xff] %vm392_vm1, %v1870_v19  ;;  %v1871_v27 = vadd.f32 %v3026_v3, %v1813_v22 }
 0x2c9   :  { %v1382_v13 = vadd.f32 %v2965_v42, %v1324_v5  ;;  %v1383_v14 = vadd.f32 %v2965_v42, %v1325_v54 }
 0x2ca   :  { %1928 = vst [vmem:[#allocation8 + $0x4a0] sm:$0xff] %v1871_v27 }
 0x2cb   :  { %v1745_v62 = vpop.f32.mrf.mxu3  ;;  %1439 = vst [vmem:[#allocation8 + $0x350] sm:$0xff] %v1382_v13 }
 0x2cc   :  { %v1814_v29 = vmul.f32 %v3021_v25, %v1745_v62  ;;  %1440 = vst.msk [vmem:[#allocation8 + $0x358] sm:$0xff] %vm392_vm1, %v1383_v14 }
 0x2cd   :  { %v1647_v33 = vpop.f32.mrf.mxu2 }
 0x2ce   :  { %v1872_v48 = vadd.f32 %v3026_v3, %v1814_v29  ;;  %v1815_v34 = vmul.f32 %v3021_v25, %v1647_v33  ;;  %v1165_v38 = vpop.f32.mrf.mxu0  ;;  %v1266_v23 = vpop.f32.mrf.mxu1 }
 0x2cf   :  { %v1326_v17 = vmul.f32 %v2960_v37, %v1165_v38  ;;  %v1327_v36 = vmul.f32 %v2960_v37, %v1266_v23 }
 0x2d0   :  { %1929 = vst.msk [vmem:[#allocation8 + $0x4a8] sm:$0xff] %vm392_vm1, %v1872_v48  ;;  %v1873_v58 = vadd.f32 %v3026_v3, %v1815_v34 }
 0x2d1   :  { %v1384_v24 = vadd.f32 %v2965_v42, %v1326_v17  ;;  %v1385_v0 = vadd.f32 %v2965_v42, %v1327_v36 }
 0x2d2   :  { %1930 = vst [vmem:[#allocation8 + $0x4b0] sm:$0xff] %v1873_v58 }
 0x2d3   :  { %v1748_v40 = vpop.f32.mrf.mxu3  ;;  %1441 = vst [vmem:[#allocation8 + $0x360] sm:$0xff] %v1384_v24 }
 0x2d4   :  { %v1816_v8 = vmul.f32 %v3021_v25, %v1748_v40  ;;  %1442 = vst.msk [vmem:[#allocation8 + $0x368] sm:$0xff] %vm392_vm1, %v1385_v0 }
 0x2d5   :  { %v1650_v44 = vpop.f32.mrf.mxu2 }
 0x2d6   :  { %v1874_v60 = vadd.f32 %v3026_v3, %v1816_v8  ;;  %v1817_v49 = vmul.f32 %v3021_v25, %v1650_v44  ;;  %v1168_v28 = vpop.f32.mrf.mxu0  ;;  %v1269_v41 = vpop.f32.mrf.mxu1 }
 0x2d7   :  { %v1328_v30 = vmul.f32 %v2960_v37, %v1168_v28  ;;  %v1329_v31 = vmul.f32 %v2960_v37, %v1269_v41 }
 0x2d8   :  { %1931 = vst.msk [vmem:[#allocation8 + $0x4b8] sm:$0xff] %vm392_vm1, %v1874_v60  ;;  %v1875_v50 = vadd.f32 %v3026_v3, %v1817_v49 }
 0x2d9   :  { %v1386_v39 = vadd.f32 %v2965_v42, %v1328_v30  ;;  %v1387_v55 = vadd.f32 %v2965_v42, %v1329_v31 }
 0x2da   :  { %1932 = vst [vmem:[#allocation8 + $0x4c0] sm:$0xff] %v1875_v50 }
 0x2db   :  { %v1751_v51 = vpop.f32.mrf.mxu3  ;;  %1443 = vst [vmem:[#allocation8 + $0x370] sm:$0xff] %v1386_v39 }
 0x2dc   :  { %v1818_v53 = vmul.f32 %v3021_v25, %v1751_v51  ;;  %1444 = vst.msk [vmem:[#allocation8 + $0x378] sm:$0xff] %vm392_vm1, %v1387_v55 }
 0x2dd   :  { %v1653_v57 = vpop.f32.mrf.mxu2 }
 0x2de   :  { %v1876_v10 = vadd.f32 %v3026_v3, %v1818_v53  ;;  %v1819_v63 = vmul.f32 %v3021_v25, %v1653_v57 }
 0x2e0   :  { %1933 = vst.msk [vmem:[#allocation8 + $0x4c8] sm:$0xff] %vm392_vm1, %v1876_v10  ;;  %v1877_v35 = vadd.f32 %v3026_v3, %v1819_v63 }
 0x2e2   :  { %1934 = vst [vmem:[#allocation8 + $0x4d0] sm:$0xff] %v1877_v35 }
 0x2e3   :  { %v1754_v2 = vpop.f32.mrf.mxu3 }
 0x2e4   :  { %v1820_v4 = vmul.f32 %v3021_v25, %v1754_v2 }
 0x2e5   :  { %v1656_v11 = vpop.f32.mrf.mxu2 }
 0x2e6   :  { %v1878_v7 = vadd.f32 %v3026_v3, %v1820_v4  ;;  %v1821_v20 = vmul.f32 %v3021_v25, %v1656_v11 }
 0x2e8   :  { %1935 = vst.msk [vmem:[#allocation8 + $0x4d8] sm:$0xff] %vm392_vm1, %v1878_v7  ;;  %v1879_v52 = vadd.f32 %v3026_v3, %v1821_v20 }
 0x2ea   :  { %1936 = vst [vmem:[#allocation8 + $0x4e0] sm:$0xff] %v1879_v52 }
 0x2eb   :  { %v1757_v16 = vpop.f32.mrf.mxu3 }
 0x2ec   :  { %v1822_v61 = vmul.f32 %v3021_v25, %v1757_v16 }
 0x2ed   :  { %v1659_v21 = vpop.f32.mrf.mxu2 }
 0x2ee   :  { %v1880_v19 = vadd.f32 %v3026_v3, %v1822_v61  ;;  %v1823_v22 = vmul.f32 %v3021_v25, %v1659_v21 }
 0x2f0   :  { %1937 = vst.msk [vmem:[#allocation8 + $0x4e8] sm:$0xff] %vm392_vm1, %v1880_v19  ;;  %v1881_v27 = vadd.f32 %v3026_v3, %v1823_v22 }
 0x2f2   :  { %1938 = vst [vmem:[#allocation8 + $0x4f0] sm:$0xff] %v1881_v27 }
 0x2f3   :  { %v1760_v62 = vpop.f32.mrf.mxu3 }
 0x2f4   :  { %v1824_v29 = vmul.f32 %v3021_v25, %v1760_v62 }
 0x2f5   :  { %v1662_v33 = vpop.f32.mrf.mxu2 }
 0x2f6   :  { %v1882_v48 = vadd.f32 %v3026_v3, %v1824_v29  ;;  %v1825_v34 = vmul.f32 %v3021_v25, %v1662_v33 }
 0x2f8   :  { %1939 = vst.msk [vmem:[#allocation8 + $0x4f8] sm:$0xff] %vm392_vm1, %v1882_v48  ;;  %v1883_v58 = vadd.f32 %v3026_v3, %v1825_v34 }
 0x2fa   :  { %1940 = vst [vmem:[#allocation8 + $0x500] sm:$0xff] %v1883_v58 }
 0x2fb   :  { %v1763_v40 = vpop.f32.mrf.mxu3 }
 0x2fc   :  { %v1826_v37 = vmul.f32 %v3021_v25, %v1763_v40 }
 0x2fd   :  { %v1665_v6 = vpop.f32.mrf.mxu2 }
 0x2fe   :  { %v1884_v8 = vadd.f32 %v3026_v3, %v1826_v37  ;;  %v1827_v43 = vmul.f32 %v3021_v25, %v1665_v6 }
 0x300   :  { %1941 = vst.msk [vmem:[#allocation8 + $0x508] sm:$0xff] %vm392_vm1, %v1884_v8  ;;  %v1885_v42 = vadd.f32 %v3026_v3, %v1827_v43 }
 0x302   :  { %1942 = vst [vmem:[#allocation8 + $0x510] sm:$0xff] %v1885_v42 }
 0x303   :  { %v1766_v32 = vpop.f32.mrf.mxu3 }
 0x304   :  { %v1828_v46 = vmul.f32 %v3021_v25, %v1766_v32 }
 0x305   :  { %v1668_v44 = vpop.f32.mrf.mxu2 }
 0x306   :  { %v1886_v60 = vadd.f32 %v3026_v3, %v1828_v46  ;;  %v1829_v49 = vmul.f32 %v3021_v25, %v1668_v44 }
 0x308   :  { %1943 = vst.msk [vmem:[#allocation8 + $0x518] sm:$0xff] %vm392_vm1, %v1886_v60  ;;  %v1887_v45 = vadd.f32 %v3026_v3, %v1829_v49 }
 0x30a   :  { %1944 = vst [vmem:[#allocation8 + $0x520] sm:$0xff] %v1887_v45 }
 0x30b   :  { %v1769_v9 = vpop.f32.mrf.mxu3 }
 0x30c   :  { %v1830_v50 = vmul.f32 %v3021_v25, %v1769_v9 }
 0x30d   :  { %v1671_v53 = vpop.f32.mrf.mxu2 }
 0x30e   :  { %v1888_v51 = vadd.f32 %v3026_v3, %v1830_v50  ;;  %v1831_v18 = vmul.f32 %v3021_v25, %v1671_v53 }
 0x310   :  { %1945 = vst.msk [vmem:[#allocation8 + $0x528] sm:$0xff] %vm392_vm1, %v1888_v51  ;;  %v1889_v56 = vadd.f32 %v3026_v3, %v1831_v18 }
 0x312   :  { %1946 = vst [vmem:[#allocation8 + $0x530] sm:$0xff] %v1889_v56 }
 0x313   :  { %v1772_v59 = vpop.f32.mrf.mxu3 }
 0x314   :  { %v1832_v12 = vmul.f32 %v3021_v25, %v1772_v59 }
 0x316   :  { %v1890_v10 = vadd.f32 %v3026_v3, %v1832_v12 }
 0x318   :  { %1947 = vst.msk [vmem:[#allocation8 + $0x538] sm:$0xff] %vm392_vm1, %v1890_v10 }
 0x319   :  { %1960 = dma.vmem_to_hbm [thread:$0]  %s1953_s22, 21504, %s1955_s25, [#allocation4], %s2266_s26, %s2266_s26, %s2267_s27  }
 0x31a   :  { %2261 = dma.done.wait [#allocation4], 21504  }
 0x31b   :  { %2262 = vsyncadd [#allocation4], 4294945792 }
 0x31c   :  { %1965 = vsyncpa [#allocation4], 1 }
 0x31d   :  { %1966 = vsyncpa [#allocation5], 1 }
 0x31e   :  { %1967 = vsyncpa [#allocation7], 1 }

</bundles_post_ra>
